<compile_context>
chip_gen: v7x
topology: tpu7x:2x2x1
jax: 0.10.0
libtpu: 0.0.40
codegen_flags: <defaults>
</compile_context>

<pallas_src>
import functools

import jax
import jax.numpy as jnp
from jax import lax
from jax.experimental import pallas as pl
from jax.experimental.pallas import tpu as pltpu


def _round_up(x, m):
    return (x + m - 1) // m * m


def _nbytes(shape, dtype):
    n = 1
    for s in shape:
        n *= int(s)
    return n * jnp.dtype(dtype).itemsize


# ----------------------------- shared kernel math ----------------------------
def _y1_y2(up_flat, low, w_sq1, w_sq2, w_taps, b_gwc, w_pwc2, *, W, thw):
    """Compute Y1 (GWC + folded PWC1) and Y2 (PWC2 + identity) for one row tile.

    up_flat : (UP, FLATP)  halo-padded flattened rows (see _build_up_tiles); the
              output region starts at flat offset W+1 and the 3x3 tap (dh, dw)
              reads offset + dh*W + dw.
    low     : (LOW, thw)
    Returns y1, y2 : (C, thw) float32.
    """
    f32 = jnp.float32
    dot = functools.partial(jnp.dot, preferred_element_type=f32)
    PAD = W + 1
    UPS = w_sq1.shape[0]

    up_sq = dot(w_sq1, up_flat.astype(f32))            # (UPS, FLATP) f32
    low_sq = dot(w_sq2, low.astype(f32))               # (LOWS, thw)  f32

    # column-validity masks (hoisted out of the tap loop); rows never wrap because
    # the halo rows / zero rows are part of up_flat.
    col = lax.broadcasted_iota(jnp.int32, (1, thw), 1) % W
    mask_l = col >= 1            # tap with dw == -1 reads col-1 >= 0
    mask_r = col <= W - 2        # tap with dw == +1 reads col+1 <= W-1

    y1 = None
    for kh in range(3):
        for kw in range(3):
            dh, dw = kh - 1, kw - 1
            off = PAD + dh * W + dw
            tap = up_sq[:, off:off + thw]               # (UPS, thw) f32
            if dw == -1:
                tap = jnp.where(mask_l, tap, 0.0)
            elif dw == 1:
                tap = jnp.where(mask_r, tap, 0.0)
            contrib = dot(w_taps[kh * 3 + kw], tap)     # (C, thw) f32
            y1 = contrib if y1 is None else y1 + contrib
    y1 = y1 + b_gwc                                     # (C, thw) f32
    y2 = dot(w_pwc2, low_sq)                            # (C, thw) f32  (PWC2 + identity)
    return y1, y2


# ------------------------- single-pass kernel (small HW) ---------------------
def _cru_single_kernel(up_ref, low_ref, w_sq1_ref, w_sq2_ref, w_taps_ref,
                       b_gwc_ref, w_pwc2_ref, o_ref, *, W, NB):
    # up_ref : (NB, 1, UP, FLATP)   low_ref : (NB, LOW, HW)   o_ref : (NB, C, HW)
    hw = o_ref.shape[-1]
    inv_hw = 1.0 / float(hw)
    w_sq1 = w_sq1_ref[...]
    w_sq2 = w_sq2_ref[...]
    w_taps = w_taps_ref[...]
    b_gwc = b_gwc_ref[...]
    w_pwc2 = w_pwc2_ref[...]

    for b in range(NB):  # static unroll over the images of this grid step
        y1, y2 = _y1_y2(up_ref[b, 0], low_ref[b], w_sq1, w_sq2, w_taps,
                        b_gwc, w_pwc2, W=W, thw=hw)
        # global average pool + softmax over the virtual 2C-channel concat.
        p1 = jnp.sum(y1, axis=1, keepdims=True) * inv_hw        # (C, 1)
        p2 = jnp.sum(y2, axis=1, keepdims=True) * inv_hw        # (C, 1)
        m = jnp.maximum(jnp.max(p1, axis=0, keepdims=True),
                        jnp.max(p2, axis=0, keepdims=True))      # (1, 1)
        e1 = jnp.exp(p1 - m)
        e2 = jnp.exp(p2 - m)
        denom = jnp.sum(e1, axis=0, keepdims=True) + jnp.sum(e2, axis=0, keepdims=True)
        r = 1.0 / denom                                          # exact; one scalar
        o_ref[b] = (y1 * (e1 * r) + y2 * (e2 * r)).astype(o_ref.dtype)


# --------------------- two-pass row-tiled kernels (large HW) ------------------
def _cru_pool_kernel(up_ref, low_ref, w_sq1_ref, w_sq2_ref, w_taps_ref,
                     b_gwc_ref, w_pwc2_ref, pooled_ref, *, W):
    # pass A: accumulate per-channel spatial sums of Y1 / Y2 into (1, C, 2) f32.
    t = pl.program_id(1)

    @pl.when(t == 0)
    def _():
        pooled_ref[...] = jnp.zeros(pooled_ref.shape, pooled_ref.dtype)

    thw = low_ref.shape[-1]
    y1, y2 = _y1_y2(up_ref[0, 0], low_ref[0], w_sq1_ref[...], w_sq2_ref[...],
                    w_taps_ref[...], b_gwc_ref[...], w_pwc2_ref[...], W=W, thw=thw)
    s1 = jnp.sum(y1, axis=1, keepdims=True)                      # (C, 1)
    s2 = jnp.sum(y2, axis=1, keepdims=True)                      # (C, 1)
    pooled_ref[0] = pooled_ref[0] + jnp.concatenate([s1, s2], axis=1)


def _cru_scale_kernel(scale_ref, up_ref, low_ref, w_sq1_ref, w_sq2_ref, w_taps_ref,
                      b_gwc_ref, w_pwc2_ref, o_ref, *, W):
    # pass B: recompute the tile and apply the precomputed softmax channel weights.
    thw = o_ref.shape[-1]
    y1, y2 = _y1_y2(up_ref[0, 0], low_ref[0], w_sq1_ref[...], w_sq2_ref[...],
                    w_taps_ref[...], b_gwc_ref[...], w_pwc2_ref[...], W=W, thw=thw)
    s = scale_ref[0]                                             # (C, 2) f32
    o_ref[0] = (y1 * s[:, 0:1] + y2 * s[:, 1:2]).astype(o_ref.dtype)


# ------------------------------- host helpers ---------------------------------
def _build_up_tiles(up, row_tile, in_dtype):
    """up: (N, UP, H, W) -> (N, T, UP, FLATP) halo-padded, flattened row tiles.

    Per-tile layout along the last axis:
      [1 zero][top-halo row (W)][row_tile rows (row_tile*W)][bottom-halo row (W)][zeros]
    so output position (r, c) of the tile sits at flat offset (W+1) + r*W + c and the
    3x3 tap (dh, dw) reads offset + dh*W + dw.  With T == 1 this degenerates to the
    whole image zero-padded by W+1 on the flat spatial axis.
    """
    up = up.astype(in_dtype)
    N, UP, H, W = up.shape
    TH = row_tile
    T = H // TH
    flat = (TH + 2) * W
    FLATP = _round_up(flat + 2, 128)
    hpad = jnp.pad(up, ((0, 0), (0, 0), (1, 1), (0, 0)))          # (N, UP, H+2, W)
    top = hpad[:, :, 0:(T - 1) * TH + 1:TH, :]                    # (N, UP, T, W)
    bot = hpad[:, :, TH + 1:T * TH + 2:TH, :]                     # (N, UP, T, W)
    main = hpad[:, :, 1:H + 1, :].reshape(N, UP, T, TH * W)       # (N, UP, T, TH*W)
    zl = jnp.zeros((N, UP, T, 1), up.dtype)
    zr = jnp.zeros((N, UP, T, FLATP - flat - 1), up.dtype)
    tiles = jnp.concatenate([zl, top, main, bot, zr], axis=-1)    # (N, UP, T, FLATP)
    return jnp.moveaxis(tiles, 2, 1), FLATP                       # (N, T, UP, FLATP)


def _physical_vmem_bytes():
    try:
        return int(pltpu.get_tpu_info().vmem_capacity_bytes)
    except Exception:
        return 64 * 2 ** 20   # conservative default (v7x per-TensorCore VMEM)


def _kernel_vmem_bytes(nb, UP, LOW, C, UPS, LOWS, flatp, thw, in_dt, out_dt):
    """Rough per-grid-step VMEM footprint (double-buffered I/O + f32 temporaries)."""
    io = 2 * (_nbytes((nb, UP, flatp), in_dt) + _nbytes((nb, LOW, thw), in_dt)
              + _nbytes((nb, C, thw), out_dt))
    weights = 2 * (_nbytes((UPS, UP), jnp.float32) + _nbytes((LOWS, LOW), jnp.float32)
                   + _nbytes((9, C, UPS), jnp.float32) + _nbytes((C, 1), jnp.float32)
                   + _nbytes((C, LOWS), jnp.float32))
    tmp = (_nbytes((UP, flatp), jnp.float32) + _nbytes((LOW, thw), jnp.float32)
           + _nbytes((UPS, flatp), jnp.float32) + _nbytes((LOWS, thw), jnp.float32)
           + _nbytes((UPS, thw), jnp.float32)            # one masked tap
           + 3 * _nbytes((C, thw), jnp.float32))         # y1, y2, scaled sum
    return io + weights + tmp + (2 << 20)


# ---------------------------------- wrapper ------------------------------------
def cru_forward(x, params, *, in_dtype=jnp.bfloat16, out_dtype=jnp.bfloat16,
                row_tile=None, vmem_budget_bytes=None):
    """x: (N, C, H, W) float32 (PyTorch NCHW). Returns (N, C, H, W) in out_dtype."""
    N, C, H, W = x.shape
    UP = params["up_channel"]
    LOW = C - UP
    HW = H * W

    w_sq1 = params["w_sq1"]                    # (UPS, UP)   f32
    w_sq2 = params["w_sq2"]                    # (LOWS, LOW) f32
    w_taps = params["w_gwc_taps"]              # (9, C, UPS) f32, PWC1 folded into tap 4
    b_gwc = params["b_gwc"].reshape(C, 1)      # (C, 1)      f32
    w_pwc2 = params["w_pwc2_ext"]              # (C, LOWS)   f32  ([PWC2 ; I])
    UPS, LOWS = w_sq1.shape[0], w_sq2.shape[0]

    up = x[:, :UP]
    low = x[:, UP:].reshape(N, LOW, HW).astype(in_dtype)

    phys = _physical_vmem_bytes()
    budget = vmem_budget_bytes or int(0.7 * phys)
    out_isize = jnp.dtype(out_dtype).itemsize

    flatp_full = _round_up((H + 2) * W + 2, 128)
    single_need1 = _kernel_vmem_bytes(1, UP, LOW, C, UPS, LOWS, flatp_full, HW,
                                      in_dtype, out_dtype)
    flops_img = int(2 * HW * (UPS * UP + LOWS * LOW + 9 * UPS * C + LOWS * C))

    # --------------------------- pick execution mode ---------------------------
    use_single = row_tile is None and single_need1 <= budget
    if row_tile is None and not use_single:
        cands = [th for th in range(1, H + 1)
                 if H % th == 0 and (th * W) % 128 == 0]
        fitting = [th for th in cands
                   if _kernel_vmem_bytes(1, UP, LOW, C, UPS, LOWS,
                                         _round_up((th + 2) * W + 2, 128),
                                         th * W, in_dtype, out_dtype) <= budget]
        if fitting:
            row_tile = max(fitting)
        elif cands:
            row_tile = min(cands)     # best effort
        else:
            # TODO(synk): pad W so row tiles can be 128-lane aligned; until then run
            # the whole image as one block and let the compiler spill if needed.
            use_single = True

    if use_single:
        # ---------------- single-pass: whole image per step, NB images/step ----
        nb = 1
        for cand in range(2, min(N, 8) + 1):
            if N % cand == 0 and _kernel_vmem_bytes(cand, UP, LOW, C, UPS, LOWS,
                                                    flatp_full, HW, in_dtype,
                                                    out_dtype) <= budget:
                nb = cand
        up_tiles, FLATP = _build_up_tiles(up, H, in_dtype)        # (N, 1, UP, FLATP)
        need = _kernel_vmem_bytes(nb, UP, LOW, C, UPS, LOWS, FLATP, HW,
                                  in_dtype, out_dtype)
        vmem_limit = int(min(max(need + (8 << 20), 32 << 20), int(0.9 * phys)))
        G = N // nb
        cost = pl.CostEstimate(
            flops=int(N * (flops_img + 4 * C * HW)),
            transcendentals=int(N * 2 * C),
            bytes_accessed=int(up_tiles.size * up_tiles.dtype.itemsize
                               + low.size * low.dtype.itemsize
                               + N * C * HW * out_isize))
        out = pl.pallas_call(
            functools.partial(_cru_single_kernel, W=W, NB=nb),
            out_shape=jax.ShapeDtypeStruct((N, C, HW), out_dtype),
            grid=(G,),
            in_specs=[
                pl.BlockSpec((nb, 1, UP, FLATP), lambda g: (g, 0, 0, 0)),
                pl.BlockSpec((nb, LOW, HW), lambda g: (g, 0, 0)),
                pl.BlockSpec((UPS, UP), lambda g: (0, 0)),
                pl.BlockSpec((LOWS, LOW), lambda g: (0, 0)),
                pl.BlockSpec((9, C, UPS), lambda g: (0, 0, 0)),
                pl.BlockSpec((C, 1), lambda g: (0, 0)),
                pl.BlockSpec((C, LOWS), lambda g: (0, 0)),
            ],
            out_specs=pl.BlockSpec((nb, C, HW), lambda g: (g, 0, 0)),
            compiler_params=pltpu.CompilerParams(
                dimension_semantics=("parallel",),
                vmem_limit_bytes=vmem_limit),
            cost_estimate=cost,
        )(up_tiles, low, w_sq1, w_sq2, w_taps, b_gwc, w_pwc2)
        return out.reshape(N, C, H, W)

    # -------------------- two-pass row-tiled path (large HW) -------------------
    TH = row_tile
    assert H % TH == 0, (H, TH)
    T = H // TH
    thw = TH * W
    assert thw % 128 == 0 or TH == H, (TH, W)

    up_tiles, FLATP = _build_up_tiles(up, TH, in_dtype)            # (N, T, UP, FLATP)
    need = _kernel_vmem_bytes(1, UP, LOW, C, UPS, LOWS, FLATP, thw,
                              in_dtype, out_dtype)
    vmem_limit = int(min(max(need + (8 << 20), 32 << 20), int(0.9 * phys)))
    in_bytes = int(up_tiles.size * up_tiles.dtype.itemsize + low.size * low.dtype.itemsize)

    common_specs = [
        pl.BlockSpec((1, 1, UP, FLATP), lambda n, t: (n, t, 0, 0)),
        pl.BlockSpec((1, LOW, thw), lambda n, t: (n, 0, t)),
        pl.BlockSpec((UPS, UP), lambda n, t: (0, 0)),
        pl.BlockSpec((LOWS, LOW), lambda n, t: (0, 0)),
        pl.BlockSpec((9, C, UPS), lambda n, t: (0, 0, 0)),
        pl.BlockSpec((C, 1), lambda n, t: (0, 0)),
        pl.BlockSpec((C, LOWS), lambda n, t: (0, 0)),
    ]

    # pass A: per-channel pooled sums of Y1 / Y2 (never materializes full-HW tensors)
    pooled = pl.pallas_call(
        functools.partial(_cru_pool_kernel, W=W),
        out_shape=jax.ShapeDtypeStruct((N, C, 2), jnp.float32),
        grid=(N, T),
        in_specs=common_specs,
        out_specs=pl.BlockSpec((1, C, 2), lambda n, t: (n, 0, 0)),
        compiler_params=pltpu.CompilerParams(
            dimension_semantics=("parallel", "arbitrary"),
            vmem_limit_bytes=vmem_limit),
        cost_estimate=pl.CostEstimate(flops=int(N * flops_img), transcendentals=0,
                                      bytes_accessed=in_bytes),
    )(up_tiles, low, w_sq1, w_sq2, w_taps, b_gwc, w_pwc2)

    # softmax over the virtual 2C-channel concat (tiny, plain XLA)
    logits = pooled * (1.0 / float(HW))
    m = jnp.max(logits, axis=(1, 2), keepdims=True)
    e = jnp.exp(logits - m)
    scales = (e / jnp.sum(e, axis=(1, 2), keepdims=True)).astype(jnp.float32)  # (N, C, 2)

    # pass B: recompute tiles, apply the softmax channel weights, store bf16
    out = pl.pallas_call(
        functools.partial(_cru_scale_kernel, W=W),
        out_shape=jax.ShapeDtypeStruct((N, C, HW), out_dtype),
        grid=(N, T),
        in_specs=[pl.BlockSpec((1, C, 2), lambda n, t: (n, 0, 0))] + common_specs,
        out_specs=pl.BlockSpec((1, C, thw), lambda n, t: (n, 0, t)),
        compiler_params=pltpu.CompilerParams(
            dimension_semantics=("parallel", "parallel"),
            vmem_limit_bytes=vmem_limit),
        cost_estimate=pl.CostEstimate(
            flops=int(N * (flops_img + 4 * C * HW)), transcendentals=0,
            bytes_accessed=int(in_bytes + N * C * 2 * 4 + N * C * HW * out_isize)),
    )(scales, up_tiles, low, w_sq1, w_sq2, w_taps, b_gwc, w_pwc2)
    return out.reshape(N, C, H, W)


# ----------------------- deterministic parameter init -------------------------
def init_params(key, op_channel, alpha=0.5, squeeze_radio=2,
                group_size=2, group_kernel_size=3):
    C = op_channel
    UP = int(alpha * C)
    LOW = C - UP
    UPS = UP // squeeze_radio
    LOWS = LOW // squeeze_radio
    K = group_kernel_size
    keys = jax.random.split(key, 6)
    s = 0.2

    # PyTorch Conv2d weight layout: (Cout, Cin_per_group, kh, kw)
    w_sq1_t = jax.random.normal(keys[0], (UPS, UP, 1, 1), jnp.float32) * s
    w_sq2_t = jax.random.normal(keys[1], (LOWS, LOW, 1, 1), jnp.float32) * s
    w_gwc_t = jax.random.normal(keys[2], (C, UPS // group_size, K, K), jnp.float32) * s
    b_gwc = jax.random.normal(keys[3], (C,), jnp.float32) * s
    w_pwc1_t = jax.random.normal(keys[4], (C, UPS, 1, 1), jnp.float32) * s
    w_pwc2_t = jax.random.normal(keys[5], (C - LOWS, LOWS, 1, 1), jnp.float32) * s

    # densify the grouped conv weight: (C, UPS, K, K), zeros across groups
    dense = jnp.zeros((C, UPS, K, K), jnp.float32)
    opg = C // group_size
    ipg = UPS // group_size
    for g in range(group_size):
        dense = dense.at[g * opg:(g + 1) * opg, g * ipg:(g + 1) * ipg].set(
            w_gwc_t[g * opg:(g + 1) * opg])
    # per-tap weights (9, C, UPS), tap index = kh*3 + kw; fold PWC1 into the center tap.
    w_taps = jnp.transpose(dense, (2, 3, 0, 1)).reshape(K * K, C, UPS)
    w_taps = w_taps.at[(K * K) // 2].add(w_pwc1_t[:, :, 0, 0])
    # PWC2 + identity: y2 = [w_pwc2; I] @ low_sq == concat([PWC2(low_sq), low_sq])
    w_pwc2_ext = jnp.concatenate(
        [w_pwc2_t[:, :, 0, 0], jnp.eye(LOWS, dtype=jnp.float32)], axis=0)

    return dict(
        up_channel=UP,
        w_sq1=w_sq1_t[:, :, 0, 0],       # (UPS, UP)
        w_sq2=w_sq2_t[:, :, 0, 0],       # (LOWS, LOW)
        w_gwc_taps=w_taps,               # (9, C, UPS)
        b_gwc=b_gwc,                     # (C,)
        w_pwc2_ext=w_pwc2_ext,           # (C, LOWS)
        torch=dict(w_sq1=w_sq1_t, w_sq2=w_sq2_t, w_gwc=w_gwc_t, b_gwc=b_gwc,
                   w_pwc1=w_pwc1_t, w_pwc2=w_pwc2_t),
        group_size=group_size,
    )


# --------------------------- pure-JAX reference --------------------------------
def cru_reference(x, params):
    P = lax.Precision.HIGHEST
    t = params["torch"]
    N, C, H, W = x.shape
    UP = params["up_channel"]

    up, low = x[:, :UP], x[:, UP:]

    def conv1x1(inp, w):  # w: (Cout, Cin, 1, 1)
        return jnp.einsum("nchw,oc->nohw", inp, w[:, :, 0, 0], precision=P)

    up_s = conv1x1(up, t["w_sq1"])
    low_s = conv1x1(low, t["w_sq2"])
    gwc = lax.conv_general_dilated(
        up_s, t["w_gwc"], window_strides=(1, 1), padding="SAME",
        feature_group_count=params["group_size"],
        dimension_numbers=("NCHW", "OIHW", "NCHW"),
        precision=P) + t["b_gwc"][None, :, None, None]
    y1 = gwc + conv1x1(up_s, t["w_pwc1"])
    y2 = jnp.concatenate([conv1x1(low_s, t["w_pwc2"]), low_s], axis=1)
    out = jnp.concatenate([y1, y2], axis=1)
    pooled = jnp.mean(out, axis=(2, 3), keepdims=True)
    out = jax.nn.softmax(pooled, axis=1) * out
    return out[:, :C] + out[:, C:]


# ----------------------------------- main --------------------------------------
if __name__ == "__main__":
    key = jax.random.PRNGKey(0)
    kx, kp = jax.random.split(key)

    N, C, H, W = 2, 8, 16, 16
    x = jax.random.normal(kx, (N, C, H, W), jnp.float32)
    params = init_params(kp, C)

    ref = jax.block_until_ready(cru_reference(x, params))

    # 1) single-pass path (whole image per grid step, several images batched per step)
    out_single = jax.block_until_ready(cru_forward(x, params)).astype(jnp.float32)
    # 2) row-tiled two-pass path (forced small row tile to exercise it at this size)
    out_tiled = jax.block_until_ready(
        cru_forward(x, params, row_tile=8)).astype(jnp.float32)

    for name, out in (("single-pass", out_single), ("row-tiled", out_tiled)):
        assert out.shape == (N, C, H, W), (name, out.shape)
        assert bool(jnp.all(jnp.isfinite(out))), name
        err = float(jnp.max(jnp.abs(out - ref)))
        assert err < 2e-2, f"{name}: max abs err vs reference = {err}"

    print("KERNEL_OK")
</pallas_src>

<mosaic_0001>
module attributes {stable_mosaic.version = 11 : i64} {
  func.func @_cru_single_kernel(%arg0: i32, %arg1: memref<2x1x4x384xbf16, #tpu.memory_space<vmem>>, %arg2: memref<2x4x256xbf16, #tpu.memory_space<vmem>>, %arg3: memref<2x4xf32, #tpu.memory_space<vmem>>, %arg4: memref<2x4xf32, #tpu.memory_space<vmem>>, %arg5: memref<9x8x2xf32, #tpu.memory_space<vmem>>, %arg6: memref<8x1xf32, #tpu.memory_space<vmem>>, %arg7: memref<8x2xf32, #tpu.memory_space<vmem>>, %arg8: memref<2x8x256xbf16, #tpu.memory_space<vmem>>) attributes {dimension_semantics = [#tpu.dimension_semantics<parallel>], iteration_bounds = array<i64: 1>, scalar_prefetch = 0 : i64, scratch_operands = 0 : i64, tpu.core_type = #tpu.core_type<tc>, window_params = [{transform_indices = @transform_0, window_bounds = array<i64: 2, 1, 4, 384>}, {transform_indices = @transform_1, window_bounds = array<i64: 2, 4, 256>}, {pipeline_mode = #tpu.pipeline_mode<synchronous>, transform_indices = @transform_2, window_bounds = array<i64: 2, 4>}, {pipeline_mode = #tpu.pipeline_mode<synchronous>, transform_indices = @transform_3, window_bounds = array<i64: 2, 4>}, {pipeline_mode = #tpu.pipeline_mode<synchronous>, transform_indices = @transform_4, window_bounds = array<i64: 9, 8, 2>}, {pipeline_mode = #tpu.pipeline_mode<synchronous>, transform_indices = @transform_5, window_bounds = array<i64: 8, 1>}, {pipeline_mode = #tpu.pipeline_mode<synchronous>, transform_indices = @transform_6, window_bounds = array<i64: 8, 2>}, {transform_indices = @transform_7, window_bounds = array<i64: 2, 8, 256>}]} {
    %c0 = arith.constant 0 : index
    %c0_0 = arith.constant 0 : index
    %0 = vector.load %arg3[%c0, %c0_0] : memref<2x4xf32, #tpu.memory_space<vmem>>, vector<2x4xf32>
    %c0_1 = arith.constant 0 : index
    %c0_2 = arith.constant 0 : index
    %1 = vector.load %arg4[%c0_1, %c0_2] : memref<2x4xf32, #tpu.memory_space<vmem>>, vector<2x4xf32>
    %c0_3 = arith.constant 0 : index
    %c0_4 = arith.constant 0 : index
    %c0_5 = arith.constant 0 : index
    %2 = vector.load %arg5[%c0_3, %c0_4, %c0_5] : memref<9x8x2xf32, #tpu.memory_space<vmem>>, vector<9x8x2xf32>
    %c0_6 = arith.constant 0 : index
    %c0_7 = arith.constant 0 : index
    %3 = vector.load %arg6[%c0_6, %c0_7] : memref<8x1xf32, #tpu.memory_space<vmem>>, vector<8x1xf32>
    %c0_8 = arith.constant 0 : index
    %c0_9 = arith.constant 0 : index
    %4 = vector.load %arg7[%c0_8, %c0_9] : memref<8x2xf32, #tpu.memory_space<vmem>>, vector<8x2xf32>
    %c0_10 = arith.constant 0 : index
    %c0_11 = arith.constant 0 : index
    %c0_12 = arith.constant 0 : index
    %c0_13 = arith.constant 0 : index
    %5 = vector.load %arg1[%c0_10, %c0_11, %c0_12, %c0_13] : memref<2x1x4x384xbf16, #tpu.memory_space<vmem>>, vector<1x1x4x384xbf16>
    %6 = vector.shape_cast %5 : vector<1x1x4x384xbf16> to vector<4x384xbf16>
    %c0_14 = arith.constant 0 : index
    %c0_15 = arith.constant 0 : index
    %c0_16 = arith.constant 0 : index
    %7 = vector.load %arg2[%c0_14, %c0_15, %c0_16] : memref<2x4x256xbf16, #tpu.memory_space<vmem>>, vector<1x4x256xbf16>
    %8 = vector.shape_cast %7 : vector<1x4x256xbf16> to vector<4x256xbf16>
    %9 = arith.extf %6 : vector<4x384xbf16> to vector<4x384xf32>
    %cst = arith.constant dense<0.000000e+00> : vector<2x384xf32>
    %10 = tpu.matmul %0, %9, %cst {dimension_numbers = #tpu.dot_dimension_numbers<[1], [0], [0], [1], [0, 0, 1, 1], [], []>} : vector<2x4xf32>, vector<4x384xf32>, vector<2x384xf32> -> vector<2x384xf32>
    %11 = arith.extf %8 : vector<4x256xbf16> to vector<4x256xf32>
    %cst_17 = arith.constant dense<0.000000e+00> : vector<2x256xf32>
    %12 = tpu.matmul %1, %11, %cst_17 {dimension_numbers = #tpu.dot_dimension_numbers<[1], [0], [0], [1], [0, 0, 1, 1], [], []>} : vector<2x4xf32>, vector<4x256xf32>, vector<2x256xf32> -> vector<2x256xf32>
    %13 = tpu.iota {dimensions = array<i32: 1>} : vector<1x256xi32>
    %c16_i32 = arith.constant 16 : i32
    %c0_i32 = arith.constant 0 : i32
    %14 = arith.cmpi eq, %c16_i32, %c0_i32 : i32
    %c1_i32 = arith.constant 1 : i32
    %15 = arith.select %14, %c1_i32, %c16_i32 : i32
    %16 = vector.broadcast %15 : i32 to vector<1x256xi32>
    %17 = arith.remsi %13, %16 : vector<1x256xi32>
    %c0_i32_18 = arith.constant 0 : i32
    %18 = vector.broadcast %c0_i32_18 : i32 to vector<1x256xi32>
    %19 = arith.cmpi ne, %17, %18 : vector<1x256xi32>
    %c0_i32_19 = arith.constant 0 : i32
    %20 = vector.broadcast %c0_i32_19 : i32 to vector<1x256xi32>
    %21 = arith.cmpi slt, %17, %20 : vector<1x256xi32>
    %c0_i32_20 = arith.constant 0 : i32
    %22 = arith.cmpi slt, %15, %c0_i32_20 : i32
    %23 = vector.broadcast %22 : i1 to vector<1x256xi1>
    %24 = vector.broadcast %23 : vector<1x256xi1> to vector<1x256xi1>
    %25 = arith.xori %21, %24 : vector<1x256xi1>
    %26 = arith.andi %25, %19 : vector<1x256xi1>
    %27 = vector.broadcast %15 : i32 to vector<1x256xi32>
    %28 = arith.addi %17, %27 : vector<1x256xi32>
    %29 = arith.select %26, %28, %17 : vector<1x256xi1>, vector<1x256xi32>
    %c1_i32_21 = arith.constant 1 : i32
    %30 = vector.broadcast %c1_i32_21 : i32 to vector<1x256xi32>
    %31 = arith.cmpi sge, %29, %30 : vector<1x256xi32>
    %c14_i32 = arith.constant 14 : i32
    %32 = vector.broadcast %c14_i32 : i32 to vector<1x256xi32>
    %33 = arith.cmpi sle, %29, %32 : vector<1x256xi32>
    %34 = vector.extract_strided_slice %10 {offsets = [0, 0], sizes = [2, 256], strides = [1, 1]} : vector<2x384xf32> to vector<2x256xf32>
    %cst_22 = arith.constant 0.000000e+00 : f32
    %35 = vector.shape_cast %31 : vector<1x256xi1> to vector<1x256xi1>
    %36 = vector.broadcast %35 : vector<1x256xi1> to vector<2x256xi1>
    %37 = vector.broadcast %cst_22 : f32 to vector<2x256xf32>
    %38 = arith.select %36, %34, %37 : vector<2x256xi1>, vector<2x256xf32>
    %39 = vector.extract_strided_slice %2 {offsets = [0, 0, 0], sizes = [1, 8, 2], strides = [1, 1, 1]} : vector<9x8x2xf32> to vector<1x8x2xf32>
    %40 = vector.shape_cast %39 : vector<1x8x2xf32> to vector<8x2xf32>
    %cst_23 = arith.constant dense<0.000000e+00> : vector<8x256xf32>
    %41 = tpu.matmul %40, %38, %cst_23 {dimension_numbers = #tpu.dot_dimension_numbers<[1], [0], [0], [1], [0, 0, 1, 1], [], []>} : vector<8x2xf32>, vector<2x256xf32>, vector<8x256xf32> -> vector<8x256xf32>
    %42 = vector.extract_strided_slice %10 {offsets = [0, 1], sizes = [2, 256], strides = [1, 1]} : vector<2x384xf32> to vector<2x256xf32>
    %43 = vector.extract_strided_slice %2 {offsets = [1, 0, 0], sizes = [1, 8, 2], strides = [1, 1, 1]} : vector<9x8x2xf32> to vector<1x8x2xf32>
    %44 = vector.shape_cast %43 : vector<1x8x2xf32> to vector<8x2xf32>
    %cst_24 = arith.constant dense<0.000000e+00> : vector<8x256xf32>
    %45 = tpu.matmul %44, %42, %cst_24 {dimension_numbers = #tpu.dot_dimension_numbers<[1], [0], [0], [1], [0, 0, 1, 1], [], []>} : vector<8x2xf32>, vector<2x256xf32>, vector<8x256xf32> -> vector<8x256xf32>
    %46 = arith.addf %41, %45 : vector<8x256xf32>
    %47 = vector.extract_strided_slice %10 {offsets = [0, 2], sizes = [2, 256], strides = [1, 1]} : vector<2x384xf32> to vector<2x256xf32>
    %cst_25 = arith.constant 0.000000e+00 : f32
    %48 = vector.shape_cast %33 : vector<1x256xi1> to vector<1x256xi1>
    %49 = vector.broadcast %48 : vector<1x256xi1> to vector<2x256xi1>
    %50 = vector.broadcast %cst_25 : f32 to vector<2x256xf32>
    %51 = arith.select %49, %47, %50 : vector<2x256xi1>, vector<2x256xf32>
    %52 = vector.extract_strided_slice %2 {offsets = [2, 0, 0], sizes = [1, 8, 2], strides = [1, 1, 1]} : vector<9x8x2xf32> to vector<1x8x2xf32>
    %53 = vector.shape_cast %52 : vector<1x8x2xf32> to vector<8x2xf32>
    %cst_26 = arith.constant dense<0.000000e+00> : vector<8x256xf32>
    %54 = tpu.matmul %53, %51, %cst_26 {dimension_numbers = #tpu.dot_dimension_numbers<[1], [0], [0], [1], [0, 0, 1, 1], [], []>} : vector<8x2xf32>, vector<2x256xf32>, vector<8x256xf32> -> vector<8x256xf32>
    %55 = arith.addf %46, %54 : vector<8x256xf32>
    %56 = vector.extract_strided_slice %10 {offsets = [0, 16], sizes = [2, 256], strides = [1, 1]} : vector<2x384xf32> to vector<2x256xf32>
    %cst_27 = arith.constant 0.000000e+00 : f32
    %57 = vector.shape_cast %31 : vector<1x256xi1> to vector<1x256xi1>
    %58 = vector.broadcast %57 : vector<1x256xi1> to vector<2x256xi1>
    %59 = vector.broadcast %cst_27 : f32 to vector<2x256xf32>
    %60 = arith.select %58, %56, %59 : vector<2x256xi1>, vector<2x256xf32>
    %61 = vector.extract_strided_slice %2 {offsets = [3, 0, 0], sizes = [1, 8, 2], strides = [1, 1, 1]} : vector<9x8x2xf32> to vector<1x8x2xf32>
    %62 = vector.shape_cast %61 : vector<1x8x2xf32> to vector<8x2xf32>
    %cst_28 = arith.constant dense<0.000000e+00> : vector<8x256xf32>
    %63 = tpu.matmul %62, %60, %cst_28 {dimension_numbers = #tpu.dot_dimension_numbers<[1], [0], [0], [1], [0, 0, 1, 1], [], []>} : vector<8x2xf32>, vector<2x256xf32>, vector<8x256xf32> -> vector<8x256xf32>
    %64 = arith.addf %55, %63 : vector<8x256xf32>
    %65 = vector.extract_strided_slice %10 {offsets = [0, 17], sizes = [2, 256], strides = [1, 1]} : vector<2x384xf32> to vector<2x256xf32>
    %66 = vector.extract_strided_slice %2 {offsets = [4, 0, 0], sizes = [1, 8, 2], strides = [1, 1, 1]} : vector<9x8x2xf32> to vector<1x8x2xf32>
    %67 = vector.shape_cast %66 : vector<1x8x2xf32> to vector<8x2xf32>
    %cst_29 = arith.constant dense<0.000000e+00> : vector<8x256xf32>
    %68 = tpu.matmul %67, %65, %cst_29 {dimension_numbers = #tpu.dot_dimension_numbers<[1], [0], [0], [1], [0, 0, 1, 1], [], []>} : vector<8x2xf32>, vector<2x256xf32>, vector<8x256xf32> -> vector<8x256xf32>
    %69 = arith.addf %64, %68 : vector<8x256xf32>
    %70 = vector.extract_strided_slice %10 {offsets = [0, 18], sizes = [2, 256], strides = [1, 1]} : vector<2x384xf32> to vector<2x256xf32>
    %cst_30 = arith.constant 0.000000e+00 : f32
    %71 = vector.shape_cast %33 : vector<1x256xi1> to vector<1x256xi1>
    %72 = vector.broadcast %71 : vector<1x256xi1> to vector<2x256xi1>
    %73 = vector.broadcast %cst_30 : f32 to vector<2x256xf32>
    %74 = arith.select %72, %70, %73 : vector<2x256xi1>, vector<2x256xf32>
    %75 = vector.extract_strided_slice %2 {offsets = [5, 0, 0], sizes = [1, 8, 2], strides = [1, 1, 1]} : vector<9x8x2xf32> to vector<1x8x2xf32>
    %76 = vector.shape_cast %75 : vector<1x8x2xf32> to vector<8x2xf32>
    %cst_31 = arith.constant dense<0.000000e+00> : vector<8x256xf32>
    %77 = tpu.matmul %76, %74, %cst_31 {dimension_numbers = #tpu.dot_dimension_numbers<[1], [0], [0], [1], [0, 0, 1, 1], [], []>} : vector<8x2xf32>, vector<2x256xf32>, vector<8x256xf32> -> vector<8x256xf32>
    %78 = arith.addf %69, %77 : vector<8x256xf32>
    %79 = vector.extract_strided_slice %10 {offsets = [0, 32], sizes = [2, 256], strides = [1, 1]} : vector<2x384xf32> to vector<2x256xf32>
    %cst_32 = arith.constant 0.000000e+00 : f32
    %80 = vector.shape_cast %31 : vector<1x256xi1> to vector<1x256xi1>
    %81 = vector.broadcast %80 : vector<1x256xi1> to vector<2x256xi1>
    %82 = vector.broadcast %cst_32 : f32 to vector<2x256xf32>
    %83 = arith.select %81, %79, %82 : vector<2x256xi1>, vector<2x256xf32>
    %84 = vector.extract_strided_slice %2 {offsets = [6, 0, 0], sizes = [1, 8, 2], strides = [1, 1, 1]} : vector<9x8x2xf32> to vector<1x8x2xf32>
    %85 = vector.shape_cast %84 : vector<1x8x2xf32> to vector<8x2xf32>
    %cst_33 = arith.constant dense<0.000000e+00> : vector<8x256xf32>
    %86 = tpu.matmul %85, %83, %cst_33 {dimension_numbers = #tpu.dot_dimension_numbers<[1], [0], [0], [1], [0, 0, 1, 1], [], []>} : vector<8x2xf32>, vector<2x256xf32>, vector<8x256xf32> -> vector<8x256xf32>
    %87 = arith.addf %78, %86 : vector<8x256xf32>
    %88 = vector.extract_strided_slice %10 {offsets = [0, 33], sizes = [2, 256], strides = [1, 1]} : vector<2x384xf32> to vector<2x256xf32>
    %89 = vector.extract_strided_slice %2 {offsets = [7, 0, 0], sizes = [1, 8, 2], strides = [1, 1, 1]} : vector<9x8x2xf32> to vector<1x8x2xf32>
    %90 = vector.shape_cast %89 : vector<1x8x2xf32> to vector<8x2xf32>
    %cst_34 = arith.constant dense<0.000000e+00> : vector<8x256xf32>
    %91 = tpu.matmul %90, %88, %cst_34 {dimension_numbers = #tpu.dot_dimension_numbers<[1], [0], [0], [1], [0, 0, 1, 1], [], []>} : vector<8x2xf32>, vector<2x256xf32>, vector<8x256xf32> -> vector<8x256xf32>
    %92 = arith.addf %87, %91 : vector<8x256xf32>
    %93 = vector.extract_strided_slice %10 {offsets = [0, 34], sizes = [2, 256], strides = [1, 1]} : vector<2x384xf32> to vector<2x256xf32>
    %cst_35 = arith.constant 0.000000e+00 : f32
    %94 = vector.shape_cast %33 : vector<1x256xi1> to vector<1x256xi1>
    %95 = vector.broadcast %94 : vector<1x256xi1> to vector<2x256xi1>
    %96 = vector.broadcast %cst_35 : f32 to vector<2x256xf32>
    %97 = arith.select %95, %93, %96 : vector<2x256xi1>, vector<2x256xf32>
    %98 = vector.extract_strided_slice %2 {offsets = [8, 0, 0], sizes = [1, 8, 2], strides = [1, 1, 1]} : vector<9x8x2xf32> to vector<1x8x2xf32>
    %99 = vector.shape_cast %98 : vector<1x8x2xf32> to vector<8x2xf32>
    %cst_36 = arith.constant dense<0.000000e+00> : vector<8x256xf32>
    %100 = tpu.matmul %99, %97, %cst_36 {dimension_numbers = #tpu.dot_dimension_numbers<[1], [0], [0], [1], [0, 0, 1, 1], [], []>} : vector<8x2xf32>, vector<2x256xf32>, vector<8x256xf32> -> vector<8x256xf32>
    %101 = arith.addf %92, %100 : vector<8x256xf32>
    %102 = vector.broadcast %3 : vector<8x1xf32> to vector<8x256xf32>
    %103 = arith.addf %101, %102 : vector<8x256xf32>
    %cst_37 = arith.constant dense<0.000000e+00> : vector<8x256xf32>
    %104 = tpu.matmul %4, %12, %cst_37 {dimension_numbers = #tpu.dot_dimension_numbers<[1], [0], [0], [1], [0, 0, 1, 1], [], []>} : vector<8x2xf32>, vector<2x256xf32>, vector<8x256xf32> -> vector<8x256xf32>
    %cst_38 = arith.constant dense<0.000000e+00> : vector<8xf32>
    %105 = vector.multi_reduction <add>, %103, %cst_38 [1] : vector<8x256xf32> to vector<8xf32>
    %106 = vector.shape_cast %105 : vector<8xf32> to vector<8x1xf32>
    %cst_39 = arith.constant 3.906250e-03 : f32
    %107 = vector.broadcast %cst_39 : f32 to vector<8x1xf32>
    %108 = arith.mulf %106, %107 : vector<8x1xf32>
    %cst_40 = arith.constant dense<0.000000e+00> : vector<8xf32>
    %109 = vector.multi_reduction <add>, %104, %cst_40 [1] : vector<8x256xf32> to vector<8xf32>
    %110 = vector.shape_cast %109 : vector<8xf32> to vector<8x1xf32>
    %cst_41 = arith.constant 3.906250e-03 : f32
    %111 = vector.broadcast %cst_41 : f32 to vector<8x1xf32>
    %112 = arith.mulf %110, %111 : vector<8x1xf32>
    %cst_42 = arith.constant dense<0xFF800000> : vector<1xf32>
    %113 = vector.multi_reduction <maximumf>, %108, %cst_42 [0] : vector<8x1xf32> to vector<1xf32>
    %114 = vector.shape_cast %113 : vector<1xf32> to vector<1x1xf32>
    %cst_43 = arith.constant dense<0xFF800000> : vector<1xf32>
    %115 = vector.multi_reduction <maximumf>, %112, %cst_43 [0] : vector<8x1xf32> to vector<1xf32>
    %116 = vector.shape_cast %115 : vector<1xf32> to vector<1x1xf32>
    %117 = arith.maximumf %114, %116 : vector<1x1xf32>
    %118 = vector.broadcast %117 : vector<1x1xf32> to vector<8x1xf32>
    %119 = arith.subf %108, %118 : vector<8x1xf32>
    %120 = math.exp %119 : vector<8x1xf32>
    %121 = vector.broadcast %117 : vector<1x1xf32> to vector<8x1xf32>
    %122 = arith.subf %112, %121 : vector<8x1xf32>
    %123 = math.exp %122 : vector<8x1xf32>
    %cst_44 = arith.constant dense<0.000000e+00> : vector<1xf32>
    %124 = vector.multi_reduction <add>, %120, %cst_44 [0] : vector<8x1xf32> to vector<1xf32>
    %125 = vector.shape_cast %124 : vector<1xf32> to vector<1x1xf32>
    %cst_45 = arith.constant dense<0.000000e+00> : vector<1xf32>
    %126 = vector.multi_reduction <add>, %123, %cst_45 [0] : vector<8x1xf32> to vector<1xf32>
    %127 = vector.shape_cast %126 : vector<1xf32> to vector<1x1xf32>
    %128 = arith.addf %125, %127 : vector<1x1xf32>
    %cst_46 = arith.constant 1.000000e+00 : f32
    %129 = vector.broadcast %cst_46 : f32 to vector<1x1xf32>
    %130 = arith.divf %129, %128 : vector<1x1xf32>
    %131 = vector.broadcast %130 : vector<1x1xf32> to vector<8x1xf32>
    %132 = arith.mulf %120, %131 : vector<8x1xf32>
    %133 = vector.broadcast %132 : vector<8x1xf32> to vector<8x256xf32>
    %134 = arith.mulf %103, %133 : vector<8x256xf32>
    %135 = vector.broadcast %130 : vector<1x1xf32> to vector<8x1xf32>
    %136 = arith.mulf %123, %135 : vector<8x1xf32>
    %137 = vector.broadcast %136 : vector<8x1xf32> to vector<8x256xf32>
    %138 = arith.mulf %104, %137 : vector<8x256xf32>
    %139 = arith.addf %134, %138 : vector<8x256xf32>
    %140 = arith.truncf %139 : vector<8x256xf32> to vector<8x256xbf16>
    %c0_47 = arith.constant 0 : index
    %c0_48 = arith.constant 0 : index
    %c0_49 = arith.constant 0 : index
    %141 = vector.load %arg8[%c0_47, %c0_48, %c0_49] : memref<2x8x256xbf16, #tpu.memory_space<vmem>>, vector<1x8x256xbf16>
    %142 = vector.shape_cast %141 : vector<1x8x256xbf16> to vector<8x256xbf16>
    %143 = vector.shape_cast %140 : vector<8x256xbf16> to vector<1x8x256xbf16>
    tpu.vector_store %arg8[%c0_47, %c0_48, %c0_49], %143 {strides = array<i32>} : memref<2x8x256xbf16, #tpu.memory_space<vmem>>, vector<1x8x256xbf16>,
    %c1 = arith.constant 1 : index
    %c0_50 = arith.constant 0 : index
    %c0_51 = arith.constant 0 : index
    %c0_52 = arith.constant 0 : index
    %144 = vector.load %arg1[%c1, %c0_50, %c0_51, %c0_52] : memref<2x1x4x384xbf16, #tpu.memory_space<vmem>>, vector<1x1x4x384xbf16>
    %145 = vector.shape_cast %144 : vector<1x1x4x384xbf16> to vector<4x384xbf16>
    %c1_53 = arith.constant 1 : index
    %c0_54 = arith.constant 0 : index
    %c0_55 = arith.constant 0 : index
    %146 = vector.load %arg2[%c1_53, %c0_54, %c0_55] : memref<2x4x256xbf16, #tpu.memory_space<vmem>>, vector<1x4x256xbf16>
    %147 = vector.shape_cast %146 : vector<1x4x256xbf16> to vector<4x256xbf16>
    %148 = arith.extf %145 : vector<4x384xbf16> to vector<4x384xf32>
    %cst_56 = arith.constant dense<0.000000e+00> : vector<2x384xf32>
    %149 = tpu.matmul %0, %148, %cst_56 {dimension_numbers = #tpu.dot_dimension_numbers<[1], [0], [0], [1], [0, 0, 1, 1], [], []>} : vector<2x4xf32>, vector<4x384xf32>, vector<2x384xf32> -> vector<2x384xf32>
    %150 = arith.extf %147 : vector<4x256xbf16> to vector<4x256xf32>
    %cst_57 = arith.constant dense<0.000000e+00> : vector<2x256xf32>
    %151 = tpu.matmul %1, %150, %cst_57 {dimension_numbers = #tpu.dot_dimension_numbers<[1], [0], [0], [1], [0, 0, 1, 1], [], []>} : vector<2x4xf32>, vector<4x256xf32>, vector<2x256xf32> -> vector<2x256xf32>
    %152 = tpu.iota {dimensions = array<i32: 1>} : vector<1x256xi32>
    %c16_i32_58 = arith.constant 16 : i32
    %c0_i32_59 = arith.constant 0 : i32
    %153 = arith.cmpi eq, %c16_i32_58, %c0_i32_59 : i32
    %c1_i32_60 = arith.constant 1 : i32
    %154 = arith.select %153, %c1_i32_60, %c16_i32_58 : i32
    %155 = vector.broadcast %154 : i32 to vector<1x256xi32>
    %156 = arith.remsi %152, %155 : vector<1x256xi32>
    %c0_i32_61 = arith.constant 0 : i32
    %157 = vector.broadcast %c0_i32_61 : i32 to vector<1x256xi32>
    %158 = arith.cmpi ne, %156, %157 : vector<1x256xi32>
    %c0_i32_62 = arith.constant 0 : i32
    %159 = vector.broadcast %c0_i32_62 : i32 to vector<1x256xi32>
    %160 = arith.cmpi slt, %156, %159 : vector<1x256xi32>
    %c0_i32_63 = arith.constant 0 : i32
    %161 = arith.cmpi slt, %154, %c0_i32_63 : i32
    %162 = vector.broadcast %161 : i1 to vector<1x256xi1>
    %163 = vector.broadcast %162 : vector<1x256xi1> to vector<1x256xi1>
    %164 = arith.xori %160, %163 : vector<1x256xi1>
    %165 = arith.andi %164, %158 : vector<1x256xi1>
    %166 = vector.broadcast %154 : i32 to vector<1x256xi32>
    %167 = arith.addi %156, %166 : vector<1x256xi32>
    %168 = arith.select %165, %167, %156 : vector<1x256xi1>, vector<1x256xi32>
    %c1_i32_64 = arith.constant 1 : i32
    %169 = vector.broadcast %c1_i32_64 : i32 to vector<1x256xi32>
    %170 = arith.cmpi sge, %168, %169 : vector<1x256xi32>
    %c14_i32_65 = arith.constant 14 : i32
    %171 = vector.broadcast %c14_i32_65 : i32 to vector<1x256xi32>
    %172 = arith.cmpi sle, %168, %171 : vector<1x256xi32>
    %173 = vector.extract_strided_slice %149 {offsets = [0, 0], sizes = [2, 256], strides = [1, 1]} : vector<2x384xf32> to vector<2x256xf32>
    %cst_66 = arith.constant 0.000000e+00 : f32
    %174 = vector.shape_cast %170 : vector<1x256xi1> to vector<1x256xi1>
    %175 = vector.broadcast %174 : vector<1x256xi1> to vector<2x256xi1>
    %176 = vector.broadcast %cst_66 : f32 to vector<2x256xf32>
    %177 = arith.select %175, %173, %176 : vector<2x256xi1>, vector<2x256xf32>
    %178 = vector.extract_strided_slice %2 {offsets = [0, 0, 0], sizes = [1, 8, 2], strides = [1, 1, 1]} : vector<9x8x2xf32> to vector<1x8x2xf32>
    %179 = vector.shape_cast %178 : vector<1x8x2xf32> to vector<8x2xf32>
    %cst_67 = arith.constant dense<0.000000e+00> : vector<8x256xf32>
    %180 = tpu.matmul %179, %177, %cst_67 {dimension_numbers = #tpu.dot_dimension_numbers<[1], [0], [0], [1], [0, 0, 1, 1], [], []>} : vector<8x2xf32>, vector<2x256xf32>, vector<8x256xf32> -> vector<8x256xf32>
    %181 = vector.extract_strided_slice %149 {offsets = [0, 1], sizes = [2, 256], strides = [1, 1]} : vector<2x384xf32> to vector<2x256xf32>
    %182 = vector.extract_strided_slice %2 {offsets = [1, 0, 0], sizes = [1, 8, 2], strides = [1, 1, 1]} : vector<9x8x2xf32> to vector<1x8x2xf32>
    %183 = vector.shape_cast %182 : vector<1x8x2xf32> to vector<8x2xf32>
    %cst_68 = arith.constant dense<0.000000e+00> : vector<8x256xf32>
    %184 = tpu.matmul %183, %181, %cst_68 {dimension_numbers = #tpu.dot_dimension_numbers<[1], [0], [0], [1], [0, 0, 1, 1], [], []>} : vector<8x2xf32>, vector<2x256xf32>, vector<8x256xf32> -> vector<8x256xf32>
    %185 = arith.addf %180, %184 : vector<8x256xf32>
    %186 = vector.extract_strided_slice %149 {offsets = [0, 2], sizes = [2, 256], strides = [1, 1]} : vector<2x384xf32> to vector<2x256xf32>
    %cst_69 = arith.constant 0.000000e+00 : f32
    %187 = vector.shape_cast %172 : vector<1x256xi1> to vector<1x256xi1>
    %188 = vector.broadcast %187 : vector<1x256xi1> to vector<2x256xi1>
    %189 = vector.broadcast %cst_69 : f32 to vector<2x256xf32>
    %190 = arith.select %188, %186, %189 : vector<2x256xi1>, vector<2x256xf32>
    %191 = vector.extract_strided_slice %2 {offsets = [2, 0, 0], sizes = [1, 8, 2], strides = [1, 1, 1]} : vector<9x8x2xf32> to vector<1x8x2xf32>
    %192 = vector.shape_cast %191 : vector<1x8x2xf32> to vector<8x2xf32>
    %cst_70 = arith.constant dense<0.000000e+00> : vector<8x256xf32>
    %193 = tpu.matmul %192, %190, %cst_70 {dimension_numbers = #tpu.dot_dimension_numbers<[1], [0], [0], [1], [0, 0, 1, 1], [], []>} : vector<8x2xf32>, vector<2x256xf32>, vector<8x256xf32> -> vector<8x256xf32>
    %194 = arith.addf %185, %193 : vector<8x256xf32>
    %195 = vector.extract_strided_slice %149 {offsets = [0, 16], sizes = [2, 256], strides = [1, 1]} : vector<2x384xf32> to vector<2x256xf32>
    %cst_71 = arith.constant 0.000000e+00 : f32
    %196 = vector.shape_cast %170 : vector<1x256xi1> to vector<1x256xi1>
    %197 = vector.broadcast %196 : vector<1x256xi1> to vector<2x256xi1>
    %198 = vector.broadcast %cst_71 : f32 to vector<2x256xf32>
    %199 = arith.select %197, %195, %198 : vector<2x256xi1>, vector<2x256xf32>
    %200 = vector.extract_strided_slice %2 {offsets = [3, 0, 0], sizes = [1, 8, 2], strides = [1, 1, 1]} : vector<9x8x2xf32> to vector<1x8x2xf32>
    %201 = vector.shape_cast %200 : vector<1x8x2xf32> to vector<8x2xf32>
    %cst_72 = arith.constant dense<0.000000e+00> : vector<8x256xf32>
    %202 = tpu.matmul %201, %199, %cst_72 {dimension_numbers = #tpu.dot_dimension_numbers<[1], [0], [0], [1], [0, 0, 1, 1], [], []>} : vector<8x2xf32>, vector<2x256xf32>, vector<8x256xf32> -> vector<8x256xf32>
    %203 = arith.addf %194, %202 : vector<8x256xf32>
    %204 = vector.extract_strided_slice %149 {offsets = [0, 17], sizes = [2, 256], strides = [1, 1]} : vector<2x384xf32> to vector<2x256xf32>
    %205 = vector.extract_strided_slice %2 {offsets = [4, 0, 0], sizes = [1, 8, 2], strides = [1, 1, 1]} : vector<9x8x2xf32> to vector<1x8x2xf32>
    %206 = vector.shape_cast %205 : vector<1x8x2xf32> to vector<8x2xf32>
    %cst_73 = arith.constant dense<0.000000e+00> : vector<8x256xf32>
    %207 = tpu.matmul %206, %204, %cst_73 {dimension_numbers = #tpu.dot_dimension_numbers<[1], [0], [0], [1], [0, 0, 1, 1], [], []>} : vector<8x2xf32>, vector<2x256xf32>, vector<8x256xf32> -> vector<8x256xf32>
    %208 = arith.addf %203, %207 : vector<8x256xf32>
    %209 = vector.extract_strided_slice %149 {offsets = [0, 18], sizes = [2, 256], strides = [1, 1]} : vector<2x384xf32> to vector<2x256xf32>
    %cst_74 = arith.constant 0.000000e+00 : f32
    %210 = vector.shape_cast %172 : vector<1x256xi1> to vector<1x256xi1>
    %211 = vector.broadcast %210 : vector<1x256xi1> to vector<2x256xi1>
    %212 = vector.broadcast %cst_74 : f32 to vector<2x256xf32>
    %213 = arith.select %211, %209, %212 : vector<2x256xi1>, vector<2x256xf32>
    %214 = vector.extract_strided_slice %2 {offsets = [5, 0, 0], sizes = [1, 8, 2], strides = [1, 1, 1]} : vector<9x8x2xf32> to vector<1x8x2xf32>
    %215 = vector.shape_cast %214 : vector<1x8x2xf32> to vector<8x2xf32>
    %cst_75 = arith.constant dense<0.000000e+00> : vector<8x256xf32>
    %216 = tpu.matmul %215, %213, %cst_75 {dimension_numbers = #tpu.dot_dimension_numbers<[1], [0], [0], [1], [0, 0, 1, 1], [], []>} : vector<8x2xf32>, vector<2x256xf32>, vector<8x256xf32> -> vector<8x256xf32>
    %217 = arith.addf %208, %216 : vector<8x256xf32>
    %218 = vector.extract_strided_slice %149 {offsets = [0, 32], sizes = [2, 256], strides = [1, 1]} : vector<2x384xf32> to vector<2x256xf32>
    %cst_76 = arith.constant 0.000000e+00 : f32
    %219 = vector.shape_cast %170 : vector<1x256xi1> to vector<1x256xi1>
    %220 = vector.broadcast %219 : vector<1x256xi1> to vector<2x256xi1>
    %221 = vector.broadcast %cst_76 : f32 to vector<2x256xf32>
    %222 = arith.select %220, %218, %221 : vector<2x256xi1>, vector<2x256xf32>
    %223 = vector.extract_strided_slice %2 {offsets = [6, 0, 0], sizes = [1, 8, 2], strides = [1, 1, 1]} : vector<9x8x2xf32> to vector<1x8x2xf32>
    %224 = vector.shape_cast %223 : vector<1x8x2xf32> to vector<8x2xf32>
    %cst_77 = arith.constant dense<0.000000e+00> : vector<8x256xf32>
    %225 = tpu.matmul %224, %222, %cst_77 {dimension_numbers = #tpu.dot_dimension_numbers<[1], [0], [0], [1], [0, 0, 1, 1], [], []>} : vector<8x2xf32>, vector<2x256xf32>, vector<8x256xf32> -> vector<8x256xf32>
    %226 = arith.addf %217, %225 : vector<8x256xf32>
    %227 = vector.extract_strided_slice %149 {offsets = [0, 33], sizes = [2, 256], strides = [1, 1]} : vector<2x384xf32> to vector<2x256xf32>
    %228 = vector.extract_strided_slice %2 {offsets = [7, 0, 0], sizes = [1, 8, 2], strides = [1, 1, 1]} : vector<9x8x2xf32> to vector<1x8x2xf32>
    %229 = vector.shape_cast %228 : vector<1x8x2xf32> to vector<8x2xf32>
    %cst_78 = arith.constant dense<0.000000e+00> : vector<8x256xf32>
    %230 = tpu.matmul %229, %227, %cst_78 {dimension_numbers = #tpu.dot_dimension_numbers<[1], [0], [0], [1], [0, 0, 1, 1], [], []>} : vector<8x2xf32>, vector<2x256xf32>, vector<8x256xf32> -> vector<8x256xf32>
    %231 = arith.addf %226, %230 : vector<8x256xf32>
    %232 = vector.extract_strided_slice %149 {offsets = [0, 34], sizes = [2, 256], strides = [1, 1]} : vector<2x384xf32> to vector<2x256xf32>
    %cst_79 = arith.constant 0.000000e+00 : f32
    %233 = vector.shape_cast %172 : vector<1x256xi1> to vector<1x256xi1>
    %234 = vector.broadcast %233 : vector<1x256xi1> to vector<2x256xi1>
    %235 = vector.broadcast %cst_79 : f32 to vector<2x256xf32>
    %236 = arith.select %234, %232, %235 : vector<2x256xi1>, vector<2x256xf32>
    %237 = vector.extract_strided_slice %2 {offsets = [8, 0, 0], sizes = [1, 8, 2], strides = [1, 1, 1]} : vector<9x8x2xf32> to vector<1x8x2xf32>
    %238 = vector.shape_cast %237 : vector<1x8x2xf32> to vector<8x2xf32>
    %cst_80 = arith.constant dense<0.000000e+00> : vector<8x256xf32>
    %239 = tpu.matmul %238, %236, %cst_80 {dimension_numbers = #tpu.dot_dimension_numbers<[1], [0], [0], [1], [0, 0, 1, 1], [], []>} : vector<8x2xf32>, vector<2x256xf32>, vector<8x256xf32> -> vector<8x256xf32>
    %240 = arith.addf %231, %239 : vector<8x256xf32>
    %241 = vector.broadcast %3 : vector<8x1xf32> to vector<8x256xf32>
    %242 = arith.addf %240, %241 : vector<8x256xf32>
    %cst_81 = arith.constant dense<0.000000e+00> : vector<8x256xf32>
    %243 = tpu.matmul %4, %151, %cst_81 {dimension_numbers = #tpu.dot_dimension_numbers<[1], [0], [0], [1], [0, 0, 1, 1], [], []>} : vector<8x2xf32>, vector<2x256xf32>, vector<8x256xf32> -> vector<8x256xf32>
    %cst_82 = arith.constant dense<0.000000e+00> : vector<8xf32>
    %244 = vector.multi_reduction <add>, %242, %cst_82 [1] : vector<8x256xf32> to vector<8xf32>
    %245 = vector.shape_cast %244 : vector<8xf32> to vector<8x1xf32>
    %cst_83 = arith.constant 3.906250e-03 : f32
    %246 = vector.broadcast %cst_83 : f32 to vector<8x1xf32>
    %247 = arith.mulf %245, %246 : vector<8x1xf32>
    %cst_84 = arith.constant dense<0.000000e+00> : vector<8xf32>
    %248 = vector.multi_reduction <add>, %243, %cst_84 [1] : vector<8x256xf32> to vector<8xf32>
    %249 = vector.shape_cast %248 : vector<8xf32> to vector<8x1xf32>
    %cst_85 = arith.constant 3.906250e-03 : f32
    %250 = vector.broadcast %cst_85 : f32 to vector<8x1xf32>
    %251 = arith.mulf %249, %250 : vector<8x1xf32>
    %cst_86 = arith.constant dense<0xFF800000> : vector<1xf32>
    %252 = vector.multi_reduction <maximumf>, %247, %cst_86 [0] : vector<8x1xf32> to vector<1xf32>
    %253 = vector.shape_cast %252 : vector<1xf32> to vector<1x1xf32>
    %cst_87 = arith.constant dense<0xFF800000> : vector<1xf32>
    %254 = vector.multi_reduction <maximumf>, %251, %cst_87 [0] : vector<8x1xf32> to vector<1xf32>
    %255 = vector.shape_cast %254 : vector<1xf32> to vector<1x1xf32>
    %256 = arith.maximumf %253, %255 : vector<1x1xf32>
    %257 = vector.broadcast %256 : vector<1x1xf32> to vector<8x1xf32>
    %258 = arith.subf %247, %257 : vector<8x1xf32>
    %259 = math.exp %258 : vector<8x1xf32>
    %260 = vector.broadcast %256 : vector<1x1xf32> to vector<8x1xf32>
    %261 = arith.subf %251, %260 : vector<8x1xf32>
    %262 = math.exp %261 : vector<8x1xf32>
    %cst_88 = arith.constant dense<0.000000e+00> : vector<1xf32>
    %263 = vector.multi_reduction <add>, %259, %cst_88 [0] : vector<8x1xf32> to vector<1xf32>
    %264 = vector.shape_cast %263 : vector<1xf32> to vector<1x1xf32>
    %cst_89 = arith.constant dense<0.000000e+00> : vector<1xf32>
    %265 = vector.multi_reduction <add>, %262, %cst_89 [0] : vector<8x1xf32> to vector<1xf32>
    %266 = vector.shape_cast %265 : vector<1xf32> to vector<1x1xf32>
    %267 = arith.addf %264, %266 : vector<1x1xf32>
    %cst_90 = arith.constant 1.000000e+00 : f32
    %268 = vector.broadcast %cst_90 : f32 to vector<1x1xf32>
    %269 = arith.divf %268, %267 : vector<1x1xf32>
    %270 = vector.broadcast %269 : vector<1x1xf32> to vector<8x1xf32>
    %271 = arith.mulf %259, %270 : vector<8x1xf32>
    %272 = vector.broadcast %271 : vector<8x1xf32> to vector<8x256xf32>
    %273 = arith.mulf %242, %272 : vector<8x256xf32>
    %274 = vector.broadcast %269 : vector<1x1xf32> to vector<8x1xf32>
    %275 = arith.mulf %262, %274 : vector<8x1xf32>
    %276 = vector.broadcast %275 : vector<8x1xf32> to vector<8x256xf32>
    %277 = arith.mulf %243, %276 : vector<8x256xf32>
    %278 = arith.addf %273, %277 : vector<8x256xf32>
    %279 = arith.truncf %278 : vector<8x256xf32> to vector<8x256xbf16>
    %c1_91 = arith.constant 1 : index
    %c0_92 = arith.constant 0 : index
    %c0_93 = arith.constant 0 : index
    %280 = vector.load %arg8[%c1_91, %c0_92, %c0_93] : memref<2x8x256xbf16, #tpu.memory_space<vmem>>, vector<1x8x256xbf16>
    %281 = vector.shape_cast %280 : vector<1x8x256xbf16> to vector<8x256xbf16>
    %282 = vector.shape_cast %279 : vector<8x256xbf16> to vector<1x8x256xbf16>
    tpu.vector_store %arg8[%c1_91, %c0_92, %c0_93], %282 {strides = array<i32>} : memref<2x8x256xbf16, #tpu.memory_space<vmem>>, vector<1x8x256xbf16>,
    return
  }
  func.func @transform_0(%arg0: i32) -> (i32, i32, i32, i32) {
    %c0_i32 = arith.constant 0 : i32
    %c0_i32_0 = arith.constant 0 : i32
    %c0_i32_1 = arith.constant 0 : i32
    %c0_i32_2 = arith.constant 0 : i32
    return %arg0, %c0_i32, %c0_i32_0, %c0_i32_1 : i32, i32, i32, i32
  }
  func.func @transform_1(%arg0: i32) -> (i32, i32, i32) {
    %c0_i32 = arith.constant 0 : i32
    %c0_i32_0 = arith.constant 0 : i32
    %c0_i32_1 = arith.constant 0 : i32
    return %arg0, %c0_i32, %c0_i32_0 : i32, i32, i32
  }
  func.func @transform_2(%arg0: i32) -> (i32, i32) {
    %c0_i32 = arith.constant 0 : i32
    %c0_i32_0 = arith.constant 0 : i32
    %c0_i32_1 = arith.constant 0 : i32
    return %c0_i32, %c0_i32_0 : i32, i32
  }
  func.func @transform_3(%arg0: i32) -> (i32, i32) {
    %c0_i32 = arith.constant 0 : i32
    %c0_i32_0 = arith.constant 0 : i32
    %c0_i32_1 = arith.constant 0 : i32
    return %c0_i32, %c0_i32_0 : i32, i32
  }
  func.func @transform_4(%arg0: i32) -> (i32, i32, i32) {
    %c0_i32 = arith.constant 0 : i32
    %c0_i32_0 = arith.constant 0 : i32
    %c0_i32_1 = arith.constant 0 : i32
    %c0_i32_2 = arith.constant 0 : i32
    return %c0_i32, %c0_i32_0, %c0_i32_1 : i32, i32, i32
  }
  func.func @transform_5(%arg0: i32) -> (i32, i32) {
    %c0_i32 = arith.constant 0 : i32
    %c0_i32_0 = arith.constant 0 : i32
    %c0_i32_1 = arith.constant 0 : i32
    return %c0_i32, %c0_i32_0 : i32, i32
  }
  func.func @transform_6(%arg0: i32) -> (i32, i32) {
    %c0_i32 = arith.constant 0 : i32
    %c0_i32_0 = arith.constant 0 : i32
    %c0_i32_1 = arith.constant 0 : i32
    return %c0_i32, %c0_i32_0 : i32, i32
  }
  func.func @transform_7(%arg0: i32) -> (i32, i32, i32) {
    %c0_i32 = arith.constant 0 : i32
    %c0_i32_0 = arith.constant 0 : i32
    %c0_i32_1 = arith.constant 0 : i32
    return %arg0, %c0_i32, %c0_i32_0 : i32, i32, i32
  }
}

</mosaic_0001>

<bundles_post_ra>
// kernel: tpu_custom_call.1
= control target key start
LH: loop header
LB: loop body
LE: loop exit
PB: predicated region body
PF: predicated region fallthrough
CT: control target
= control target key end

     0   :  { %v2650_v2 = vmov 0.0   ;;  %vm51_vm0 = vcmask 1043456   ;;  %s3114_s0 = inlined_call_operand.vmem [shape: bf16[2,1,4,384], index: 0, kind: input, shape index: {}]   ;;  %s3115_s1 = inlined_call_operand.vmem [shape: bf16[2,4,256], index: 1, kind: input, shape index: {}]   ;;  %s3116_s2 = inlined_call_operand.vmem [shape: f32[2,4], index: 2, kind: input, shape index: {}]   ;;  %s3117_s3 = inlined_call_operand.vmem [shape: f32[2,4], index: 3, kind: input, shape index: {}]   ;;  %s3118_s4 = inlined_call_operand.vmem [shape: f32[9,8,2], index: 4, kind: input, shape index: {}]   ;;  %s3119_s5 = inlined_call_operand.vmem [shape: f32[8,1], index: 5, kind: input, shape index: {}]   ;;  %s3120_s6 = inlined_call_operand.vmem [shape: f32[8,2], index: 6, kind: input, shape index: {}]   ;;  %s3121_s7 = inlined_call_operand.hbm [shape: bf16[2,8,256], index: 7, kind: output, shape index: {}]  }
   0x1   :  { %v40_v0 = vld [vmem:[%s3114_s0] sm:$0x3f]  ;;  %122 = vmatprep.mubr.f32.mxu1 %v2650_v2  ;;  %1226 = vmatprep.mubr.f32.mxu0 %v2650_v2 }
   0x2   :  { %v42_v1 = vunpack.c.l.bf16 %v40_v0  ;;  %v2711_v3 = vld [vmem:[%s3115_s1] sm:$0xff]  }
   0x3   :  { %v199_v4 = vunpack.c.l.bf16 %v2711_v3 }
   0x4   :  { %12 = vsyncpa [#allocation3], 0  ;;  %v46_v5 = vcombine.high %v42_v1, %v42_v1  ;;  %v43_v6 = vunpack.c.h.bf16 %v40_v0  ;;  %v27_v7 = vld [vmem:[%s3116_s2] sm:$0x3]  ;;  %vm47_vm1 = vcmask 31744   ;;  %vm2651_vm2 = vmmov 0  }
   0x5   :  { %v201_v8 = vcombine.high %v199_v4, %v199_v4  ;;  %v28_v9 = vld [vmem:[%s3117_s3] sm:$0x3]  ;;  %s2652_s30 = smov 126   ;;  %s2653_s8 = smov 127   ;;  %v2510_v12 = vld [vmem:[%s3114_s0 + $0x6] sm:$0x3f]  ;;  %v1448_v21 = vunpack.c.h.bf16 %v2711_v3  ;;  %v280_v26 = vlaneseq }
   0x6   :  { %2471 = vmatprep.subr.msk.mxu1 %vm51_vm0, %v46_v5  ;;  %v1296_v14 = vunpack.c.l.bf16 %v2510_v12  ;;  %s2654_s3 = smov 112   ;;  %vm333_vm3 = vcmask 1041408   ;;  %v2758_v19 = vld [vmem:[%s3120_s6] sm:$0xff]  ;;  %vm329_vm4 = vcmask 15360   ;;  %s2655_s12 = smov 111   ;;  %v1297_v20 = vunpack.c.h.bf16 %v2510_v12  ;;  %v2803_v40 = vld [vmem:[%s3118_s4 + $0x8] sm:$0xff] }
   0x7   :  { %2472 = vmatpush1.msk.msra.mxu1 %vm51_vm0, %v42_v1  ;;  %v1450_v22 = vcombine.high %v1448_v21, %v1448_v21  ;;  %v281_v27 = vand.u32 127, %v280_v26  ;;  %vm326_vm5 = vcmask 1039360   ;;  %vm499_vm6 = vcmask 1031168   ;;  %v2835_v50 = vld [vmem:[%s3118_s4] sm:$0xff]  ;;  %v2851_v55 = vld [vmem:[%s3118_s4 + $0x10] sm:$0xff]  ;;  %v2867_v61 = vld [vmem:[%s3118_s4 + $0x18] sm:$0xff] }
   0x8   :  { %2473 = vmatmul.mubr.msk.f32.vlgmr.msra.gmra.mrb[0].mxu1 %vm47_vm1, %v27_v7  ;;  %2557 = vmatprep.subr.mxu1 %v2650_v2  ;;  %v1300_v17 = vcombine.high %v1296_v14, %v1296_v14  ;;  %vm594_vm10 = vcmask 916480   ;;  %vm689_vm12 = vcmask 908288   ;;  %v2656_v59 = vmov 0   ;;  %s2657_s20 = smov 110   ;;  %s2658_s21 = smov 96   ;;  %v36_v38 = vld [vmem:[%s3118_s4 + $0x38] sm:$0xff] }
   0x9   :  { %2558 = vmatpush3.msk.msra.mxu1 %vm51_vm0, %v43_v6  ;;  %2559 = vmatprep.mubr.msk.f32.mxu1 %vm2651_vm2, %v2650_v2  ;;  %v282_v29 = vadd.s32 128, %v281_v27  ;;  %v287_v34 = vand.u32 15, %v281_v27  ;;  %s2659_s22 = smov 95   ;;  %s2660_s23 = smov 94   ;;  %vm778_vm13 = vcmask 900096   ;;  %vm873_vm14 = vcmask 785408  }
   0xa   :  { %2476 = vmatprep.subr.msk.mxu1 %vm51_vm0, %v201_v8  ;;  %2613 = vset.pattern.permute.xlu0 %v2656_v59  ;;  %vm968_vm15 = vcmask 777216  }
   0xb   :  { %v294_v32 = vand.u32 15, %v282_v29  ;;  %vm2795_vm8 = vcmp.ge.s32.totalorder %v287_v34, 1  ;;  %vm2827_vm11 = vcmp.le.s32.totalorder %v287_v34, 14 }
   0xc   :  { %2560 = vmatmul.mubr.msk.f32.vlgmr.msra.gmra.mrb[2].mxu1 %vm47_vm1, %v27_v7 }
   0xd   :  { %2477 = vmatpush1.msk.msra.mxu1 %vm51_vm0, %v199_v4  ;;  %273 = vmatprep.mubr.f32.mxu1 %v2650_v2  ;;  %vm2791_vm7 = vcmp.ge.s32.totalorder %v294_v32, 1  ;;  %vm2806_vm9 = vcmp.le.s32.totalorder %v294_v32, 14 }
  0x10   :  { %2478 = vmatmul.mubr.msk.f32.vlgmr.msra.gmra.mrb[4].mxu1 %vm47_vm1, %v28_v9 }
  0x11   :  { %402 = vmatprep.mubr.f32.mxu1 %v2650_v2 }
  0xdb   :  { %v2734_v10 = vpop.f32.mrb[0].mxu1 }
  0xdc   :  { %493 = vrot.lane.b32.xlu0 %v2734_v10, %s2652_s30  ;;  %320 = vrot.lane.b32.xlu1 %v2734_v10, %s2653_s8  ;;  %v2740_v11 = vpop.f32.mrb[1].mxu1  ;;  %v315_v45 = vsel %vm2795_vm8, %v2734_v10, 0.0 }
  0xdd   :  { %v316_v44 = vsel %vm2791_vm7, %v2740_v11, 0.0 }
  0xdf   :  { %v2745_v13 = vpop.f32.mrb[2].mxu1 }
  0xe0   :  { %588 = vrot.lane.b32.xlu0 %v2734_v10, %s2654_s3  ;;  %497 = vrot.lane.b32.xlu1 %v2745_v13, %s2652_s30  ;;  %v2561_v15 = vpop.f32.mrb[3].mxu1 }
  0xe3   :  { %v275_v16 = vpop.f32.mrb[4].mxu1 }
  0xe4   :  { %322 = vrot.lane.b32.xlu0 %v2740_v11, %s2653_s8  ;;  %592 = vrot.lane.b32.xlu1 %v2745_v13, %s2654_s3  ;;  %v277_v18 = vpop.f32.mrb[5].mxu1 }
  0xe5   :  { %2506 = vmatprep.subr.msk.mxu0 %vm333_vm3, %v277_v18 }
  0xe6   :  { %2507 = vmatpush1.msk.msra.mxu0 %vm333_vm3, %v275_v16 }
  0xe7   :  { %2508 = vmatmul.mubr.msk.f32.vlgmr.msra.gmra.mrb[0].mxu0 %vm329_vm4, %v2758_v19  ;;  %2512 = vmatprep.subr.msk.mxu0 %vm51_vm0, %v1300_v17 }
  0xe8   :  { %495 = vrot.lane.b32.xlu0 %v2740_v11, %s2652_s30  ;;  %687 = vrot.lane.b32.xlu1 %v2745_v13, %s2655_s12 }
  0xe9   :  { %2513 = vmatpush1.msk.msra.mxu0 %vm51_vm0, %v1296_v14  ;;  %1371 = vmatprep.mubr.f32.mxu0 %v2650_v2 }
  0xea   :  { %2562 = vmatprep.subr.mxu0 %v2650_v2 }
  0xeb   :  { %2514 = vmatmul.mubr.msk.f32.vlgmr.msra.gmra.mrb[2].mxu0 %vm47_vm1, %v27_v7 }
  0xec   :  { %590 = vrot.lane.b32.xlu0 %v2740_v11, %s2654_s3  ;;  %2563 = vmatpush3.msk.msra.mxu0 %vm51_vm0, %v1297_v20 }
  0xed   :  { %2564 = vmatprep.mubr.msk.f32.mxu0 %vm2651_vm2, %v2650_v2  ;;  %2517 = vmatprep.subr.msk.mxu0 %vm51_vm0, %v1450_v22 }
  0xef   :  { %2565 = vmatmul.mubr.msk.f32.vlgmr.msra.gmra.mrb[4].mxu0 %vm47_vm1, %v27_v7  ;;  %v38_v7 = vld [vmem:[%s3119_s5] sm:$0xff] }
  0xf0   :  { %685 = vrot.lane.b32.xlu0 %v2740_v11, %s2655_s12  ;;  %1519 = vmatprep.mubr.f32.mxu0 %v2650_v2 }
  0xf1   :  { %2518 = vmatpush1.msk.msra.mxu0 %vm51_vm0, %v1448_v21  ;;  %vm1057_vm0 = vcmask 769024  }
  0xf3   :  { %2519 = vmatmul.mubr.msk.f32.vlgmr.msra.gmra.mrb[6].mxu0 %vm47_vm1, %v28_v9 }
  0xf4   :  { %324 = vrot.lane.b32.xlu0 %v2745_v13, %s2653_s8  ;;  %1607 = vmatprep.mubr.f32.mxu0 %v2650_v2 }
 0x14e   :  { %v494_v23 = vpop.permute.xlu0 %493  ;;  %v321_v31 = vpop.permute.xlu1 %320 }
 0x152   :  { %v589_v24 = vpop.permute.xlu0 %588  ;;  %v498_v37 = vpop.permute.xlu1 %497 }
 0x156   :  { %v323_v25 = vpop.permute.xlu0 %322  ;;  %v593_v47 = vpop.permute.xlu1 %592 }
 0x157   :  { %v327_v41 = vsel %vm326_vm5, %v321_v31, %v323_v25 }
 0x15a   :  { %v496_v28 = vpop.permute.xlu0 %495  ;;  %v688_v56 = vpop.permute.xlu1 %687 }
 0x15b   :  { %v501_v43 = vsel %vm499_vm6, %v496_v28, %v498_v37  ;;  %v500_v49 = vsel %vm499_vm6, %v494_v23, %v496_v28 }
 0x15c   :  { %v505_v46 = vsel %vm2806_vm9, %v501_v43, 0.0  ;;  %v504_v52 = vsel %vm2827_vm11, %v500_v49, 0.0 }
 0x15e   :  { %v591_v30 = vpop.permute.xlu0 %590 }
 0x15f   :  { %v596_v51 = vsel %vm594_vm10, %v591_v30, %v593_v47  ;;  %v595_v54 = vsel %vm594_vm10, %v589_v24, %v591_v30 }
 0x160   :  { %v600_v53 = vsel %vm2791_vm7, %v596_v51, 0.0  ;;  %v599_v57 = vsel %vm2795_vm8, %v595_v54, 0.0 }
 0x162   :  { %v2789_v33 = vpop.permute.xlu0 %685 }
 0x163   :  { %v691_v58 = vsel %vm689_vm12, %v2789_v33, %v688_v56 }
 0x166   :  { %v325_v36 = vpop.permute.xlu0 %324 }
 0x167   :  { %v328_v39 = vsel %vm326_vm5, %v323_v25, %v325_v36 }
 0x168   :  { %2479 = vmatprep.subr.msk.mxu1 %vm333_vm3, %v328_v39 }
 0x169   :  { %2480 = vmatpush1.msk.msra.mxu1 %vm333_vm3, %v327_v41 }
 0x16a   :  { %2481 = vmatmul.mubr.msk.f32.vlgmr.msra.gmra.mrb[6].mxu1 %vm329_vm4, %v2803_v40  ;;  %2482 = vmatprep.subr.msk.mxu1 %vm333_vm3, %v316_v44 }
 0x16b   :  { %2483 = vmatpush1.msk.msra.mxu1 %vm333_vm3, %v315_v45  ;;  %482 = vmatprep.mubr.f32.mxu1 %v2650_v2 }
 0x16c   :  { %2485 = vmatprep.subr.msk.mxu1 %vm333_vm3, %v505_v46  ;;  %v34_v46 = vld [vmem:[%s3118_s4 + $0x28] sm:$0xff] }
 0x172   :  { %2484 = vmatmul.mubr.msk.f32.vlgmr.msra.gmra.mrb[6].mxu1 %vm329_vm4, %v2835_v50 }
 0x173   :  { %2486 = vmatpush1.msk.msra.mxu1 %vm333_vm3, %v504_v52  ;;  %579 = vmatprep.mubr.f32.mxu1 %v2650_v2 }
 0x174   :  { %2488 = vmatprep.subr.msk.mxu1 %vm333_vm3, %v600_v53 }
 0x17a   :  { %2487 = vmatmul.mubr.msk.f32.vlgmr.msra.gmra.mrb[6].mxu1 %vm329_vm4, %v2851_v55 }
 0x17b   :  { %2489 = vmatpush1.msk.msra.mxu1 %vm333_vm3, %v599_v57  ;;  %674 = vmatprep.mubr.f32.mxu1 %v2650_v2 }
 0x17c   :  { %2491 = vmatprep.subr.msk.mxu1 %vm333_vm3, %v691_v58 }
 0x182   :  { %2490 = vmatmul.mubr.msk.f32.vlgmr.msra.gmra.mrb[6].mxu1 %vm329_vm4, %v2867_v61 }
 0x183   :  { %763 = vmatprep.mubr.f32.mxu1 %v2650_v2 }
 0x1ba   :  { %v2862_v60 = vpop.f32.mrb[0].mxu0 }
 0x1bb   :  { %v2869_v62 = vpop.f32.mrb[1].mxu0 }
 0x1bc   :  { %v1237_v63 = vadd.f32 %v2869_v62, %v2862_v60 }
 0x1be   :  { %v2876_v0 = vpop.f32.mrb[2].mxu0 }
 0x1bf   :  { %1531 = vrot.lane.b32.xlu1 %v2876_v0, %s2653_s8  ;;  %v2880_v1 = vpop.f32.mrb[3].mxu0  ;;  %v1526_v23 = vsel %vm2795_vm8, %v2876_v0, 0.0 }
 0x1c0   :  { %v1527_v20 = vsel %vm2791_vm7, %v2880_v1, 0.0 }
 0x1c2   :  { %v1444_v3 = vpop.f32.mrb[4].mxu0 }
 0x1c3   :  { %1691 = vrot.lane.b32.xlu1 %v2876_v0, %s2652_s30  ;;  %1535 = vrot.lane.b32.xlu0 %v1444_v3, %s2653_s8  ;;  %v2566_v4 = vpop.f32.mrb[5].mxu0 }
 0x1c6   :  { %v2917_v5 = vpop.f32.mrb[6].mxu0 }
 0x1c7   :  { %1782 = vrot.lane.b32.xlu1 %v2876_v0, %s2654_s3  ;;  %683 = vrot.lane.b32.xlu0 %v2734_v10, %s2655_s12  ;;  %v2919_v6 = vpop.f32.mrb[7].mxu0 }
 0x1cb   :  { %1533 = vrot.lane.b32.xlu1 %v2880_v1, %s2653_s8  ;;  %774 = vrot.lane.b32.xlu0 %v2740_v11, %s2657_s20 }
 0x1cf   :  { %1693 = vrot.lane.b32.xlu1 %v2880_v1, %s2652_s30  ;;  %772 = vrot.lane.b32.xlu0 %v2734_v10, %s2657_s20 }
 0x1d3   :  { %1784 = vrot.lane.b32.xlu1 %v2880_v1, %s2654_s3  ;;  %1695 = vrot.lane.b32.xlu0 %v1444_v3, %s2652_s30 }
 0x1d7   :  { %1875 = vrot.lane.b32.xlu1 %v2880_v1, %s2655_s12  ;;  %869 = vrot.lane.b32.xlu0 %v2740_v11, %s2658_s21 }
 0x1db   :  { %1873 = vrot.lane.b32.xlu1 %v2876_v0, %s2655_s12  ;;  %1786 = vrot.lane.b32.xlu0 %v1444_v3, %s2654_s3 }
 0x1df   :  { %776 = vrot.lane.b32.xlu1 %v2745_v13, %s2657_s20  ;;  %867 = vrot.lane.b32.xlu0 %v2734_v10, %s2658_s21 }
 0x1e3   :  { %1960 = vrot.lane.b32.xlu1 %v2880_v1, %s2657_s20  ;;  %1877 = vrot.lane.b32.xlu0 %v1444_v3, %s2655_s12 }
 0x1e7   :  { %1958 = vrot.lane.b32.xlu1 %v2876_v0, %s2657_s20  ;;  %964 = vrot.lane.b32.xlu0 %v2740_v11, %s2659_s22 }
 0x1eb   :  { %871 = vrot.lane.b32.xlu1 %v2745_v13, %s2658_s21  ;;  %1962 = vrot.lane.b32.xlu0 %v1444_v3, %s2657_s20 }
 0x1ef   :  { %2051 = vrot.lane.b32.xlu1 %v2880_v1, %s2658_s21  ;;  %962 = vrot.lane.b32.xlu0 %v2734_v10, %s2659_s22 }
 0x1f3   :  { %2049 = vrot.lane.b32.xlu1 %v2876_v0, %s2658_s21  ;;  %2053 = vrot.lane.b32.xlu0 %v1444_v3, %s2658_s21 }
 0x1f7   :  { %966 = vrot.lane.b32.xlu1 %v2745_v13, %s2659_s22  ;;  %1053 = vrot.lane.b32.xlu0 %v2740_v11, %s2660_s23 }
 0x1fb   :  { %2142 = vrot.lane.b32.xlu1 %v2880_v1, %s2659_s22  ;;  %2144 = vrot.lane.b32.xlu0 %v1444_v3, %s2659_s22 }
 0x1ff   :  { %2140 = vrot.lane.b32.xlu1 %v2876_v0, %s2659_s22  ;;  %1051 = vrot.lane.b32.xlu0 %v2734_v10, %s2660_s23  ;;  %v2932_v10 = vld [vmem:[%s3118_s4 + $0x20] sm:$0xff] }
 0x203   :  { %1055 = vrot.lane.b32.xlu1 %v2745_v13, %s2660_s23  ;;  %2229 = vrot.lane.b32.xlu0 %v1444_v3, %s2660_s23  ;;  %v35_v3 = vld [vmem:[%s3118_s4 + $0x30] sm:$0xff] }
 0x207   :  { %2227 = vrot.lane.b32.xlu1 %v2880_v1, %s2660_s23  ;;  %1148 = vperm.xlu0 %2613, %v38_v7  }
 0x20b   :  { %2225 = vrot.lane.b32.xlu1 %v2876_v0, %s2660_s23 }
 0x226   :  { %1238 = vadd.xlane.f32.xlu0 %v1237_v63 }
 0x231   :  { %v1532_v8 = vpop.permute.xlu1 %1531 }
 0x235   :  { %v1692_v9 = vpop.permute.xlu1 %1691  ;;  %v1536_v11 = vpop.permute.xlu0 %1535 }
 0x239   :  { %v1783_v12 = vpop.permute.xlu1 %1782  ;;  %v684_v14 = vpop.permute.xlu0 %683 }
 0x23a   :  { %v690_v13 = vsel %vm689_vm12, %v684_v14, %v2789_v33 }
 0x23b   :  { %2492 = vmatpush1.msk.msra.mxu1 %vm333_vm3, %v690_v13 }
 0x23c   :  { %2493 = vmatmul.mubr.msk.f32.vlgmr.msra.gmra.mrb[6].mxu1 %vm329_vm4, %v2932_v10 }
 0x23d   :  { %v1534_v15 = vpop.permute.xlu1 %1533  ;;  %v775_v16 = vpop.permute.xlu0 %774  ;;  %858 = vmatprep.mubr.f32.mxu1 %v2650_v2 }
 0x23e   :  { %v1537_v17 = vsel %vm326_vm5, %v1532_v8, %v1534_v15  ;;  %v1538_v18 = vsel %vm326_vm5, %v1534_v15, %v1536_v11 }
 0x23f   :  { %2520 = vmatprep.subr.msk.mxu0 %vm333_vm3, %v1538_v18 }
 0x240   :  { %2521 = vmatpush1.msk.msra.mxu0 %vm333_vm3, %v1537_v17 }
 0x241   :  { %v1694_v21 = vpop.permute.xlu1 %1693  ;;  %2522 = vmatmul.mubr.msk.f32.vlgmr.msra.gmra.mrb[8].mxu0 %vm329_vm4, %v2803_v40  ;;  %2523 = vmatprep.subr.msk.mxu0 %vm333_vm3, %v1527_v20  ;;  %v773_v22 = vpop.permute.xlu0 %772 }
 0x242   :  { %2524 = vmatpush1.msk.msra.mxu0 %vm333_vm3, %v1526_v23  ;;  %1684 = vmatprep.mubr.f32.mxu0 %v2650_v2  ;;  %v1697_v26 = vsel %vm499_vm6, %v1692_v9, %v1694_v21  ;;  %v779_v39 = vsel %vm778_vm13, %v773_v22, %v775_v16 }
 0x243   :  { %v1701_v29 = vsel %vm2827_vm11, %v1697_v26, 0.0  ;;  %v783_v47 = vsel %vm2827_vm11, %v779_v39, 0.0 }
 0x245   :  { %v1785_v24 = vpop.permute.xlu1 %1784  ;;  %v1696_v25 = vpop.permute.xlu0 %1695 }
 0x246   :  { %v1698_v27 = vsel %vm499_vm6, %v1694_v21, %v1696_v25  ;;  %v1788_v34 = vsel %vm594_vm10, %v1783_v12, %v1785_v24 }
 0x247   :  { %v1702_v28 = vsel %vm2806_vm9, %v1698_v27, 0.0  ;;  %v1792_v40 = vsel %vm2795_vm8, %v1788_v34, 0.0 }
 0x248   :  { %2526 = vmatprep.subr.msk.mxu0 %vm333_vm3, %v1702_v28 }
 0x249   :  { %v1876_v30 = vpop.permute.xlu1 %1875  ;;  %2525 = vmatmul.mubr.msk.f32.vlgmr.msra.gmra.mrb[8].mxu0 %vm329_vm4, %v2835_v50  ;;  %v870_v31 = vpop.permute.xlu0 %869 }
 0x24a   :  { %2527 = vmatpush1.msk.msra.mxu0 %vm333_vm3, %v1701_v29  ;;  %1773 = vmatprep.mubr.f32.mxu0 %v2650_v2  ;;  %v37_v29 = vld [vmem:[%s3118_s4 + $0x40] sm:$0xff]  ;;  %s2661_s4 = smov [#allocation2]  }
 0x24b   :  { %s2460_s10 = sshll.u32 %s2661_s4, 4  ;;  %s2461_s10 = int_to_ptr.vmem [resolvable:$true] %s2460_s10 }
 0x24c   :  { %s2626_s3 = scalar_lea.vmem %s2461_s10, 256  ;;  %p2631_p1 = scmp.lt.s32.totalorder %s2461_s10, %s2461_s10 }
 0x24d   :  { %v1874_v32 = vpop.permute.xlu1 %1873  ;;  %v1787_v33 = vpop.permute.xlu0 %1786  ;;  %p2627_p0 = scmp.ne.s32.totalorder %s2461_s10, %s2626_s3  ;;  %p2632_p2 = scmp.lt.s32.totalorder %s2626_s3, %s2626_s3 }
 0x24e   :  { %v1789_v36 = vsel %vm594_vm10, %v1785_v24, %v1787_v33  ;;  %v1879_v52 = vsel %vm689_vm12, %v1874_v32, %v1876_v30 }
 0x24f   :  { %v1793_v37 = vsel %vm2791_vm7, %v1789_v36, 0.0  ;;  %p2633_p3 = por %p2632_p2, %p2631_p1 }
 0x250   :  { %2529 = vmatprep.subr.msk.mxu0 %vm333_vm3, %v1793_v37 }
 0x251   :  { %v777_v41 = vpop.permute.xlu1 %776  ;;  %2528 = vmatmul.mubr.msk.f32.vlgmr.msra.gmra.mrb[8].mxu0 %vm329_vm4, %v2851_v55  ;;  %v868_v43 = vpop.permute.xlu0 %867  ;;  %p2634_p4 = pnand %p2633_p3, %p2627_p0 }
 0x252   :  { %v780_v44 = vsel %vm778_vm13, %v775_v16, %v777_v41  ;;  %2530 = vmatpush1.msk.msra.mxu0 %vm333_vm3, %v1792_v40  ;;  %1864 = vmatprep.mubr.f32.mxu0 %v2650_v2  ;;  %v874_v55 = vsel %vm873_vm14, %v868_v43, %v870_v31 }
 0x253   :  { %v784_v45 = vsel %vm2806_vm9, %v780_v44, 0.0  ;;  %v878_v1 = vsel %vm2795_vm8, %v874_v55, 0.0 }
 0x254   :  { %2494 = vmatprep.subr.msk.mxu1 %vm333_vm3, %v784_v45 }
 0x255   :  { %v1961_v49 = vpop.permute.xlu1 %1960  ;;  %2495 = vmatpush1.msk.msra.mxu1 %vm333_vm3, %v783_v47  ;;  %v1878_v50 = vpop.permute.xlu0 %1877 }
 0x256   :  { %v1880_v51 = vsel %vm689_vm12, %v1876_v30, %v1878_v50  ;;  %2496 = vmatmul.mubr.msk.f32.vlgmr.msra.gmra.mrb[6].mxu1 %vm329_vm4, %v34_v46 }
 0x257   :  { %2532 = vmatprep.subr.msk.mxu0 %vm333_vm3, %v1880_v51  ;;  %953 = vmatprep.mubr.f32.mxu1 %v2650_v2 }
 0x259   :  { %v1959_v53 = vpop.permute.xlu1 %1958  ;;  %2531 = vmatmul.mubr.msk.f32.vlgmr.msra.gmra.mrb[8].mxu0 %vm329_vm4, %v2867_v61  ;;  %v965_v54 = vpop.permute.xlu0 %964 }
 0x25a   :  { %2533 = vmatpush1.msk.msra.mxu0 %vm333_vm3, %v1879_v52  ;;  %1949 = vmatprep.mubr.f32.mxu0 %v2650_v2  ;;  %v1964_v58 = vsel %vm778_vm13, %v1959_v53, %v1961_v49 }
 0x25b   :  { %v1968_v4 = vsel %vm2827_vm11, %v1964_v58, 0.0 }
 0x25d   :  { %v872_v56 = vpop.permute.xlu1 %871  ;;  %v1963_v57 = vpop.permute.xlu0 %1962 }
 0x25e   :  { %v875_v59 = vsel %vm873_vm14, %v870_v31, %v872_v56  ;;  %v1965_v63 = vsel %vm778_vm13, %v1961_v49, %v1963_v57 }
 0x25f   :  { %v879_v0 = vsel %vm2791_vm7, %v875_v59, 0.0  ;;  %v1969_v61 = vsel %vm2806_vm9, %v1965_v63, 0.0 }
 0x260   :  { %2497 = vmatprep.subr.msk.mxu1 %vm333_vm3, %v879_v0  ;;  %2535 = vmatprep.subr.msk.mxu0 %vm333_vm3, %v1969_v61 }
 0x261   :  { %v2052_v7 = vpop.permute.xlu1 %2051  ;;  %2498 = vmatpush1.msk.msra.mxu1 %vm333_vm3, %v878_v1  ;;  %2534 = vmatmul.mubr.msk.f32.vlgmr.msra.gmra.mrb[8].mxu0 %vm329_vm4, %v2932_v10  ;;  %v963_v8 = vpop.permute.xlu0 %962 }
 0x262   :  { %2536 = vmatpush1.msk.msra.mxu0 %vm333_vm3, %v1968_v4  ;;  %2040 = vmatprep.mubr.f32.mxu0 %v2650_v2  ;;  %v969_v35 = vsel %vm968_vm15, %v963_v8, %v965_v54 }
 0x263   :  { %2499 = vmatmul.mubr.msk.f32.vlgmr.msra.gmra.mrb[6].mxu1 %vm329_vm4, %v35_v3 }
 0x264   :  { %1042 = vmatprep.mubr.f32.mxu1 %v2650_v2 }
 0x265   :  { %v2050_v9 = vpop.permute.xlu1 %2049  ;;  %v2054_v11 = vpop.permute.xlu0 %2053 }
 0x266   :  { %v2055_v12 = vsel %vm873_vm14, %v2050_v9, %v2052_v7  ;;  %v2056_v14 = vsel %vm873_vm14, %v2052_v7, %v2054_v11 }
 0x267   :  { %v2059_v13 = vsel %vm2795_vm8, %v2055_v12, 0.0  ;;  %v2060_v10 = vsel %vm2791_vm7, %v2056_v14, 0.0 }
 0x268   :  { %2538 = vmatprep.subr.msk.mxu0 %vm333_vm3, %v2060_v10 }
 0x269   :  { %v967_v15 = vpop.permute.xlu1 %966  ;;  %2537 = vmatmul.mubr.msk.f32.vlgmr.msra.gmra.mrb[8].mxu0 %vm329_vm4, %v34_v46  ;;  %v1054_v16 = vpop.permute.xlu0 %1053 }
 0x26a   :  { %v970_v17 = vsel %vm968_vm15, %v965_v54, %v967_v15  ;;  %2539 = vmatpush1.msk.msra.mxu0 %vm333_vm3, %v2059_v13  ;;  %2131 = vmatprep.mubr.f32.mxu0 %v2650_v2 }
 0x26b   :  { %2500 = vmatprep.subr.msk.mxu1 %vm333_vm3, %v970_v17 }
 0x26c   :  { %2501 = vmatpush1.msk.msra.mxu1 %vm333_vm3, %v969_v35 }
 0x26d   :  { %v2143_v18 = vpop.permute.xlu1 %2142  ;;  %v2145_v20 = vpop.permute.xlu0 %2144  ;;  %2502 = vmatmul.mubr.msk.f32.vlgmr.msra.gmra.mrb[6].mxu1 %vm329_vm4, %v36_v38 }
 0x26e   :  { %v2147_v21 = vsel %vm968_vm15, %v2143_v18, %v2145_v20  ;;  %1137 = vmatprep.mubr.f32.mxu1 %v2650_v2 }
 0x26f   :  { %2541 = vmatprep.subr.msk.mxu0 %vm333_vm3, %v2147_v21 }
 0x271   :  { %v2141_v22 = vpop.permute.xlu1 %2140  ;;  %2540 = vmatmul.mubr.msk.f32.vlgmr.msra.gmra.mrb[8].mxu0 %vm329_vm4, %v35_v3  ;;  %v1052_v24 = vpop.permute.xlu0 %1051 }
 0x272   :  { %v2146_v23 = vsel %vm968_vm15, %v2141_v22, %v2143_v18  ;;  %2216 = vmatprep.mubr.f32.mxu0 %v2650_v2  ;;  %v1058_v25 = vsel %vm1057_vm0, %v1052_v24, %v1054_v16 }
 0x273   :  { %2542 = vmatpush1.msk.msra.mxu0 %vm333_vm3, %v2146_v23  ;;  %v1062_v30 = vsel %vm2827_vm11, %v1058_v25, 0.0 }
 0x275   :  { %v1056_v26 = vpop.permute.xlu1 %1055  ;;  %v2230_v31 = vpop.permute.xlu0 %2229 }
 0x276   :  { %v1059_v27 = vsel %vm1057_vm0, %v1054_v16, %v1056_v26 }
 0x277   :  { %v1063_v28 = vsel %vm2806_vm9, %v1059_v27, 0.0 }
 0x278   :  { %2503 = vmatprep.subr.msk.mxu1 %vm333_vm3, %v1063_v28 }
 0x279   :  { %v2228_v32 = vpop.permute.xlu1 %2227  ;;  %2504 = vmatpush1.msk.msra.mxu1 %vm333_vm3, %v1062_v30  ;;  %2543 = vmatmul.mubr.msk.f32.vlgmr.msra.gmra.mrb[8].mxu0 %vm329_vm4, %v36_v38 }
 0x27a   :  { %v2232_v33 = vsel %vm1057_vm0, %v2228_v32, %v2230_v31  ;;  %2505 = vmatmul.mubr.msk.f32.vlgmr.msra.gmra.mrb[6].mxu1 %vm329_vm4, %v37_v29  ;;  %2307 = vmatprep.mubr.f32.mxu0 %v2650_v2 }
 0x27b   :  { %v2236_v34 = vsel %vm2806_vm9, %v2232_v33, 0.0  ;;  %2547 = vmatprep.subr.msk.mxu1 %vm333_vm3, %v2919_v6  ;;  %2388 = vmatprep.mubr.f32.mxu1 %v2650_v2 }
 0x27c   :  { %2544 = vmatprep.subr.msk.mxu0 %vm333_vm3, %v2236_v34  ;;  %2548 = vmatpush1.msk.msra.mxu1 %vm333_vm3, %v2917_v5 }
 0x27d   :  { %v2226_v36 = vpop.permute.xlu1 %2225 }
 0x27e   :  { %v2231_v37 = vsel %vm1057_vm0, %v2226_v36, %v2228_v32  ;;  %2549 = vmatmul.mubr.msk.f32.vlgmr.msra.gmra.mrb[8].mxu1 %vm329_vm4, %v2758_v19 }
 0x27f   :  { %v2235_v42 = vsel %vm2827_vm11, %v2231_v37, 0.0 }
 0x280   :  { %2545 = vmatpush1.msk.msra.mxu0 %vm333_vm3, %v2235_v42 }
 0x281   :  { %2546 = vmatmul.mubr.msk.f32.vlgmr.msra.gmra.mrb[8].mxu0 %vm329_vm4, %v37_v29 }
 0x286   :  { %v1149_v6 = vpop.permute.xlu0 %1148 }
 0x2b3   :  { %v1239_v50 = vpop.xlane.xlu0 %1238 }
 0x2b4   :  { %v1240_v51 = vmul.f32 0.00390625, %v1239_v50 }
 0x2b6   :  { %v1247_v52 = vrot.slane %v1240_v51, 4 }
 0x2b8   :  { %v1248_v53 = vmax.f32 %v1240_v51, %v1247_v52 }
 0x2ba   :  { %v1249_v55 = vrot.slane %v1248_v53, 2 }
 0x2bc   :  { %v1250_v63 = vmax.f32 %v1248_v53, %v1249_v55 }
 0x2be   :  { %v1251_v8 = vrot.slane %v1250_v63, 1 }
 0x2c0   :  { %v1252_v16 = vmax.f32 %v1250_v63, %v1251_v8 }
 0x34d   :  { %v1139_v2 = vpop.f32.mrb[6].mxu1 }
 0x34e   :  { %v3076_v39 = vadd.f32 %v1149_v6, %v1139_v2  ;;  %v1141_v40 = vpop.f32.mrb[7].mxu1 }
 0x34f   :  { %v3078_v41 = vadd.f32 %v1149_v6, %v1141_v40 }
 0x351   :  { %v1233_v5 = vadd.f32 %v3078_v41, %v3076_v39  ;;  %v3082_v43 = vpop.f32.mrb[8].mxu1 }
 0x352   :  { %v3084_v19 = vpop.f32.mrb[9].mxu1 }
 0x353   :  { %1234 = vadd.xlane.f32.xlu1 %v1233_v5  ;;  %v2399_v48 = vadd.f32 %v3084_v19, %v3082_v43 }
 0x354   :  { %v2309_v44 = vpop.f32.mrb[8].mxu0 }
 0x355   :  { %v3088_v45 = vadd.f32 %v2309_v44, %v1149_v6  ;;  %v2311_v46 = vpop.f32.mrb[9].mxu0  ;;  %2400 = vadd.xlane.f32.xlu0 %v2399_v48 }
 0x356   :  { %v3090_v47 = vadd.f32 %v2311_v46, %v1149_v6 }
 0x358   :  { %v2395_v49 = vadd.f32 %v3090_v47, %v3088_v45 }
 0x35a   :  { %2396 = vadd.xlane.f32.xlu1 %v2395_v49 }
 0x3e0   :  { %v1235_v54 = vpop.xlane.xlu1 %1234 }
 0x3e1   :  { %v1236_v56 = vmul.f32 0.00390625, %v1235_v54 }
 0x3e2   :  { %v2401_v57 = vpop.xlane.xlu0 %2400 }
 0x3e3   :  { %v1241_v58 = vrot.slane %v1236_v56, 4  ;;  %v2402_v59 = vmul.f32 0.00390625, %v2401_v57 }
 0x3e5   :  { %v1242_v0 = vmax.f32 %v1236_v56, %v1241_v58  ;;  %v2409_v61 = vrot.slane %v2402_v59, 4 }
 0x3e7   :  { %v1243_v1 = vrot.slane %v1242_v0, 2  ;;  %v2397_v3 = vpop.xlane.xlu1 %2396  ;;  %v2410_v4 = vmax.f32 %v2402_v59, %v2409_v61 }
 0x3e8   :  { %v2398_v7 = vmul.f32 0.00390625, %v2397_v3 }
 0x3e9   :  { %v1244_v9 = vmax.f32 %v1242_v0, %v1243_v1  ;;  %v2411_v11 = vrot.slane %v2410_v4, 2 }
 0x3ea   :  { %v2403_v12 = vrot.slane %v2398_v7, 4 }
 0x3eb   :  { %v1245_v14 = vrot.slane %v1244_v9, 1  ;;  %v2412_v10 = vmax.f32 %v2410_v4, %v2411_v11 }
 0x3ec   :  { %v2404_v13 = vmax.f32 %v2398_v7, %v2403_v12 }
 0x3ed   :  { %v1246_v15 = vmax.f32 %v1244_v9, %v1245_v14  ;;  %v2413_v18 = vrot.slane %v2412_v10, 1 }
 0x3ee   :  { %v2405_v17 = vrot.slane %v2404_v13, 2 }
 0x3ef   :  { %v1253_v38 = vmax.f32 %v1246_v15, %v1252_v16  ;;  %v2414_v26 = vmax.f32 %v2412_v10, %v2413_v18 }
 0x3f0   :  { %v2406_v35 = vmax.f32 %v2404_v13, %v2405_v17 }
 0x3f1   :  { %v1254_v20 = vsub.f32 %v1236_v56, %v1253_v38  ;;  %v1257_v21 = vsub.f32 %v1240_v51, %v1253_v38 }
 0x3f2   :  { %v2407_v22 = vrot.slane %v2406_v35, 1 }
 0x3f3   :  { %v1255_v23 = vmul.f32 1.442695, %v1254_v20  ;;  %v1258_v24 = vmul.f32 1.442695, %v1257_v21 }
 0x3f4   :  { %v2408_v25 = vmax.f32 %v2406_v35, %v2407_v22 }
 0x3f5   :  { %2614 = vpow2.f32 %v1255_v23 }
 0x3f6   :  { %2616 = vpow2.f32 %v1258_v24  ;;  %v2415_v27 = vmax.f32 %v2408_v25, %v2414_v26 }
 0x3f8   :  { %v2416_v28 = vsub.f32 %v2398_v7, %v2415_v27  ;;  %v2419_v29 = vsub.f32 %v2402_v59, %v2415_v27 }
 0x3fa   :  { %v2417_v30 = vmul.f32 1.442695, %v2416_v28  ;;  %v2420_v31 = vmul.f32 1.442695, %v2419_v29 }
 0x3fc   :  { %2618 = vpow2.f32 %v2417_v30 }
 0x3fd   :  { %2620 = vpow2.f32 %v2420_v31 }
 0x3ff   :  { %v2615_v32 = vpop.eup %2614 }
 0x400   :  { %v2617_v33 = vpop.eup %2616  ;;  %v1260_v34 = vrot.slane %v2615_v32, 4 }
 0x401   :  { %v1266_v36 = vrot.slane %v2617_v33, 4 }
 0x402   :  { %v1261_v37 = vadd.f32 %v2615_v32, %v1260_v34 }
 0x403   :  { %v1267_v42 = vadd.f32 %v2617_v33, %v1266_v36 }
 0x404   :  { %v1262_v6 = vrot.slane %v1261_v37, 2 }
 0x405   :  { %v1268_v2 = vrot.slane %v1267_v42, 2 }
 0x406   :  { %v2619_v40 = vpop.eup %2618  ;;  %v1263_v5 = vadd.f32 %v1262_v6, %v1261_v37 }
 0x407   :  { %v2621_v48 = vpop.eup %2620  ;;  %v2422_v44 = vrot.slane %v2619_v40, 4  ;;  %v1269_v46 = vadd.f32 %v1268_v2, %v1267_v42 }
 0x408   :  { %v2428_v49 = vrot.slane %v2621_v48, 4  ;;  %v1264_v50 = vrot.slane %v1263_v5, 1 }
 0x409   :  { %v1270_v51 = vrot.slane %v1269_v46, 1  ;;  %v2423_v52 = vadd.f32 %v2619_v40, %v2422_v44 }
 0x40a   :  { %v2429_v53 = vadd.f32 %v2621_v48, %v2428_v49  ;;  %v1265_v54 = vadd.f32 %v1264_v50, %v1263_v5 }
 0x40b   :  { %v1271_v55 = vadd.f32 %v1270_v51, %v1269_v46  ;;  %v2424_v56 = vrot.slane %v2423_v52, 2 }
 0x40c   :  { %v2430_v57 = vrot.slane %v2429_v53, 2 }
 0x40d   :  { %v1272_v58 = vadd.f32 %v1271_v55, %v1265_v54  ;;  %v2425_v59 = vadd.f32 %v2424_v56, %v2423_v52 }
 0x40e   :  { %v2431_v63 = vadd.f32 %v2430_v57, %v2429_v53 }
 0x40f   :  { %2622 = vrcp.f32 %v1272_v58  ;;  %v2426_v0 = vrot.slane %v2425_v59, 1 }
 0x410   :  { %v2432_v61 = vrot.slane %v2431_v63, 1 }
 0x411   :  { %v2427_v1 = vadd.f32 %v2426_v0, %v2425_v59 }
 0x412   :  { %v2433_v3 = vadd.f32 %v2432_v61, %v2431_v63 }
 0x414   :  { %v2434_v4 = vadd.f32 %v2433_v3, %v2427_v1 }
 0x416   :  { %2624 = vrcp.f32 %v2434_v4 }
 0x419   :  { %v2623_v7 = vpop.eup %2622 }
 0x41a   :  { %v1275_v8 = vmul.f32 %v2623_v7, %v2615_v32  ;;  %v1278_v9 = vmul.f32 %v2623_v7, %v2617_v33 }
 0x41c   :  { %v1276_v11 = vmul.f32 %v1275_v8, %v3076_v39  ;;  %v1277_v12 = vmul.f32 %v1275_v8, %v3078_v41  ;;  %v1279_v14 = vmul.f32 %v1278_v9, %v2862_v60  ;;  %v1280_v13 = vmul.f32 %v1278_v9, %v2869_v62 }
 0x41e   :  { %v1281_v10 = vadd.f32 %v1279_v14, %v1276_v11  ;;  %v1282_v15 = vadd.f32 %v1280_v13, %v1277_v12 }
 0x420   :  { %v2625_v16 = vpop.eup %2624  ;;  %v2551_v17 = vpack.c.bf16 %v1282_v15, %v1281_v10 }
 0x421   :  { %v2437_v38 = vmul.f32 %v2625_v16, %v2619_v40  ;;  %v2440_v35 = vmul.f32 %v2625_v16, %v2621_v48 }
 0x422   :  { %1291 = vst [vmem:[#allocation2] sm:$0xff] %v2551_v17 }
 0x423   :  { %v2438_v18 = vmul.f32 %v2437_v38, %v3088_v45  ;;  %v2439_v20 = vmul.f32 %v2437_v38, %v3090_v47  ;;  %v2441_v21 = vmul.f32 %v2440_v35, %v3082_v43  ;;  %v2442_v39 = vmul.f32 %v2440_v35, %v3084_v19 }
 0x425   :  { %v2443_v60 = vadd.f32 %v2441_v21, %v2438_v18  ;;  %v2444_v41 = vadd.f32 %v2442_v39, %v2439_v20 }
 0x427   :  { %v2552_v62 = vpack.c.bf16 %v2444_v41, %v2443_v60 }
 0x429   :  { %2454 = vst [vmem:[#allocation2 + $0x8] sm:$0xff] %v2552_v62 }
 0x42a   :  { %2637 = shalt.err (!%p2634_p4)
}
 0x42b   :  { %s2638_s12 = scalar_lea.hbm %s3121_s7, 256 }
 0x42c   :  { %p2639_p5 = scmp.ne.s32.totalorder %s3121_s7, %s2638_s12  ;;  %p2642_p6 = scmp.lt.u32.totalorder %s2638_s12, %s3121_s7 }
 0x42e   :  { %p2644_p7 = pnand %p2642_p6, %p2639_p5 }
 0x430   :  { %2647 = shalt.err (!%p2644_p7)
}
 0x431   :  { %s2662_s16 = smov 128   ;;  %s2663_s17 = smov 8  }
 0x432   :  { %2466 = dma.vmem_to_hbm [thread:$0]  %s2461_s10, 256, %s3121_s7, [#allocation3], %s2662_s16, %s2662_s16, %s2663_s17  }
 0x433   :  { %2648 = dma.done.wait [#allocation3], 256  }
 0x434   :  { %2649 = vsyncadd [#allocation3], 4294967040 }
 0x435   :  { %2470 = vsyncpa [#allocation3], 1 }

</bundles_post_ra>
